<compile_context>
chip_gen: v6e
topology: v6e:2x2x1
jax: 0.10.0
libtpu: 0.0.40
codegen_flags: <defaults>
</compile_context>

<pallas_src>
import functools

import jax
import jax.numpy as jnp
from jax import lax
from jax.experimental import pallas as pl
from jax.experimental.pallas import tpu as pltpu


_NEG_BIG = -1e9  # bias for padded class lanes; exp(_NEG_BIG - max) == 0 in f32


# ----------------------------------------------------------------------------
# Fused VAT kernel
# ----------------------------------------------------------------------------
def _vat_fused_kernel(x_ref, w_ref, b_ref, d0_ref, lds_ref, *,
                      xi, eps, ip, matmul_dtype):
    """Fully fused VAT forward.

    x_ref  : (B, D)     flattened input, f32, VMEM-resident
    w_ref  : (D, NPAD)  classifier weight, zero-padded to NPAD (multiple of 128)
    b_ref  : (1, NPAD)  classifier bias, padded lanes = _NEG_BIG
    d0_ref : (B, D)     raw random direction (uniform - 0.5), normalized here
    lds_ref: (1, 1)     scalar KL(batchmean) output in SMEM
    """
    f32 = jnp.float32
    x = x_ref[...]
    w = w_ref[...]
    b = b_ref[...]
    B = x.shape[0]

    w_mxu = w.astype(matmul_dtype)

    def logits_of(inp):
        # (B, D) @ (D, NPAD) on the MXU with f32 accumulation.
        return jnp.dot(inp.astype(matmul_dtype), w_mxu,
                       preferred_element_type=f32) + b

    def log_softmax_parts(logits):
        m = jnp.max(logits, axis=-1, keepdims=True)
        z = logits - m
        e = jnp.exp(z)
        s = jnp.sum(e, axis=-1, keepdims=True)
        return z - jnp.log(s), e, s            # (log_softmax, exp(z), sum)

    def l2_normalize(d):
        # torch: d / (||d||_2 + 1e-8); the (B, D) array only sees a multiply,
        # the reciprocal of the (B, 1) norm goes to the EUP.
        nrm = jnp.sqrt(jnp.sum(d * d, axis=-1, keepdims=True))
        return d * pl.reciprocal(nrm + 1e-8, approx=True)

    # ---- pred = softmax(model(x), dim=1) (no perturbation, no zeros DMA) ----
    logp0, e0, s0 = log_softmax_parts(logits_of(x))
    pred = e0 / s0                      # exact: this is the fixed KL target
    # constant KL term, fixed across every iteration: sum(pred * log(pred))
    c_term = jnp.sum(pred * logp0)

    # ---- d = l2_normalize(rand - 0.5) ----
    d = l2_normalize(d0_ref[...])

    # ---- power iteration on the adversarial direction (ip is static) ----
    for _ in range(ip):
        logp_hat, e_h, s_h = log_softmax_parts(logits_of(x + xi * d))
        p_hat = e_h * pl.reciprocal(s_h, approx=True)
        # dKL/dlogits_hat = (p_hat - pred) / B; the 1/B and chain-rule xi
        # factors are positive scalars cancelled by the following L2-normalize.
        grad_logits = p_hat - pred
        grad_d = lax.dot_general(
            grad_logits.astype(matmul_dtype), w_mxu,
            (((1,), (1,)), ((), ())),           # contract over the class axis
            preferred_element_type=f32)
        d = l2_normalize(grad_d)

    # ---- lds = KL(pred || softmax(model(x + eps*d))), reduction='batchmean' --
    logp_hat, _, _ = log_softmax_parts(logits_of(x + eps * d))
    lds_ref[0, 0] = (c_term - jnp.sum(pred * logp_hat)) / B


# ----------------------------------------------------------------------------
# Wrapper (padding, RNG, single pallas_call)
# ----------------------------------------------------------------------------
def vat_class_loss(x, w, b, key, xi=10.0, eps=1.0, ip=1,
                   matmul_dtype=jnp.float32):
    """x: (B, C, H, W) f32; model(x, r) = (x + r).view(B,-1) @ w + b.
    Returns scalar LDS (KL divergence, reduction='batchmean').
    Pass matmul_dtype=jnp.bfloat16 on v6e/v7x for bf16 MXU operands."""
    B = x.shape[0]
    D, num_classes = w.shape
    n_pad = pl.cdiv(num_classes, 128) * 128     # lane-dense class axis

    x_flat = x.reshape(B, D).astype(jnp.float32)
    # Zero-pad W's columns and set padded bias lanes very negative so padded
    # classes get softmax probability exactly 0 (and zero gradient).
    w_pad = jnp.zeros((D, n_pad), jnp.float32).at[:, :num_classes].set(
        w.astype(jnp.float32))
    b_pad = jnp.full((1, n_pad), _NEG_BIG, jnp.float32).at[0, :num_classes].set(
        b.astype(jnp.float32))

    # d = rand(x.shape) - 0.5 (L2-normalized inside the kernel)
    d0 = jax.random.uniform(key, (B, D), dtype=jnp.float32) - 0.5

    # TODO(synk): for production-scale B*D, add a D-tile grid axis (accumulate
    # the matmuls and L2 partial sums across tiles, "parallel" batch axis for
    # v7x's 2 TCs) so the resident working set fits 64 MiB VMEM; at this toy
    # size everything fits untiled.
    lds = pl.pallas_call(
        functools.partial(_vat_fused_kernel, xi=float(xi), eps=float(eps),
                          ip=int(ip), matmul_dtype=matmul_dtype),
        out_shape=jax.ShapeDtypeStruct((1, 1), jnp.float32),
        out_specs=pl.BlockSpec(memory_space=pltpu.SMEM),
    )(x_flat, w_pad, b_pad, d0)
    return lds[0, 0]


if __name__ == "__main__":
    B, C, H, W = 2, 4, 16, 16
    NUM_CLASSES = 8
    D = C * H * W

    key = jax.random.PRNGKey(0)
    k_x, k_w, k_b, k_d = jax.random.split(key, 4)

    x = jax.random.normal(k_x, (B, C, H, W), dtype=jnp.float32)
    # deterministic synthetic "model" parameters (linear classifier)
    w = jax.random.normal(k_w, (D, NUM_CLASSES), dtype=jnp.float32) * 0.02
    b = jax.random.normal(k_b, (NUM_CLASSES,), dtype=jnp.float32) * 0.01

    lds = vat_class_loss(x, w, b, k_d, xi=10.0, eps=1.0, ip=1)
    lds = jax.block_until_ready(lds)
    assert jnp.isfinite(lds)
    print("KERNEL_OK")
</pallas_src>

<mosaic_0001>
module attributes {stable_mosaic.version = 11 : i64} {
  func.func @_vat_fused_kernel(%arg0: memref<2x1024xf32, #tpu.memory_space<vmem>>, %arg1: memref<1024x128xf32, #tpu.memory_space<vmem>>, %arg2: memref<1x128xf32, #tpu.memory_space<vmem>>, %arg3: memref<2x1024xf32, #tpu.memory_space<vmem>>, %arg4: memref<1x1xf32, #tpu.memory_space<smem>>) attributes {dimension_semantics = [], scalar_prefetch = 0 : i64, scratch_operands = 0 : i64, tpu.core_type = #tpu.core_type<tc>} {
    %c0 = arith.constant 0 : index
    %c0_0 = arith.constant 0 : index
    %0 = vector.load %arg0[%c0, %c0_0] : memref<2x1024xf32, #tpu.memory_space<vmem>>, vector<2x1024xf32>
    %c0_1 = arith.constant 0 : index
    %c0_2 = arith.constant 0 : index
    %1 = vector.load %arg1[%c0_1, %c0_2] : memref<1024x128xf32, #tpu.memory_space<vmem>>, vector<1024x128xf32>
    %c0_3 = arith.constant 0 : index
    %c0_4 = arith.constant 0 : index
    %2 = vector.load %arg2[%c0_3, %c0_4] : memref<1x128xf32, #tpu.memory_space<vmem>>, vector<1x128xf32>
    %cst = arith.constant dense<0.000000e+00> : vector<2x128xf32>
    %3 = tpu.matmul %0, %1, %cst {dimension_numbers = #tpu.dot_dimension_numbers<[1], [0], [0], [1], [0, 0, 1, 1], [], []>} : vector<2x1024xf32>, vector<1024x128xf32>, vector<2x128xf32> -> vector<2x128xf32>
    %4 = vector.broadcast %2 : vector<1x128xf32> to vector<2x128xf32>
    %5 = arith.addf %3, %4 : vector<2x128xf32>
    %cst_5 = arith.constant dense<0xFF800000> : vector<2xf32>
    %6 = vector.multi_reduction <maximumf>, %5, %cst_5 [1] : vector<2x128xf32> to vector<2xf32>
    %7 = vector.shape_cast %6 : vector<2xf32> to vector<2x1xf32>
    %8 = vector.broadcast %7 : vector<2x1xf32> to vector<2x128xf32>
    %9 = arith.subf %5, %8 : vector<2x128xf32>
    %10 = math.exp %9 : vector<2x128xf32>
    %cst_6 = arith.constant dense<0.000000e+00> : vector<2xf32>
    %11 = vector.multi_reduction <add>, %10, %cst_6 [1] : vector<2x128xf32> to vector<2xf32>
    %12 = vector.shape_cast %11 : vector<2xf32> to vector<2x1xf32>
    %13 = math.log %12 : vector<2x1xf32>
    %14 = vector.broadcast %13 : vector<2x1xf32> to vector<2x128xf32>
    %15 = arith.subf %9, %14 : vector<2x128xf32>
    %16 = vector.broadcast %12 : vector<2x1xf32> to vector<2x128xf32>
    %17 = arith.divf %10, %16 : vector<2x128xf32>
    %18 = arith.mulf %17, %15 : vector<2x128xf32>
    %19 = vector.shape_cast %18 : vector<2x128xf32> to vector<1x2x128xf32>
    %cst_7 = arith.constant dense<0.000000e+00> : vector<1xf32>
    %20 = vector.multi_reduction <add>, %19, %cst_7 [1, 2] : vector<1x2x128xf32> to vector<1xf32>
    %21 = vector.shape_cast %20 : vector<1xf32> to vector<1x1x1xf32>
    %22 = vector.extract %21[0, 0, 0] : f32 from vector<1x1x1xf32>
    %c0_8 = arith.constant 0 : index
    %c0_9 = arith.constant 0 : index
    %23 = vector.load %arg3[%c0_8, %c0_9] : memref<2x1024xf32, #tpu.memory_space<vmem>>, vector<2x1024xf32>
    %24 = arith.mulf %23, %23 : vector<2x1024xf32>
    %cst_10 = arith.constant dense<0.000000e+00> : vector<2xf32>
    %25 = vector.multi_reduction <add>, %24, %cst_10 [1] : vector<2x1024xf32> to vector<2xf32>
    %26 = vector.shape_cast %25 : vector<2xf32> to vector<2x1xf32>
    %27 = math.sqrt %26 : vector<2x1xf32>
    %cst_11 = arith.constant 9.99999993E-9 : f32
    %28 = vector.broadcast %cst_11 : f32 to vector<2x1xf32>
    %29 = arith.addf %27, %28 : vector<2x1xf32>
    %30 = tpu.reciprocal %29 {approx = true} : vector<2x1xf32> -> vector<2x1xf32>
    %31 = vector.broadcast %30 : vector<2x1xf32> to vector<2x1024xf32>
    %32 = arith.mulf %23, %31 : vector<2x1024xf32>
    %cst_12 = arith.constant 1.000000e+01 : f32
    %33 = vector.broadcast %cst_12 : f32 to vector<2x1024xf32>
    %34 = arith.mulf %33, %32 : vector<2x1024xf32>
    %35 = arith.addf %0, %34 : vector<2x1024xf32>
    %cst_13 = arith.constant dense<0.000000e+00> : vector<2x128xf32>
    %36 = tpu.matmul %35, %1, %cst_13 {dimension_numbers = #tpu.dot_dimension_numbers<[1], [0], [0], [1], [0, 0, 1, 1], [], []>} : vector<2x1024xf32>, vector<1024x128xf32>, vector<2x128xf32> -> vector<2x128xf32>
    %37 = vector.broadcast %2 : vector<1x128xf32> to vector<2x128xf32>
    %38 = arith.addf %36, %37 : vector<2x128xf32>
    %cst_14 = arith.constant dense<0xFF800000> : vector<2xf32>
    %39 = vector.multi_reduction <maximumf>, %38, %cst_14 [1] : vector<2x128xf32> to vector<2xf32>
    %40 = vector.shape_cast %39 : vector<2xf32> to vector<2x1xf32>
    %41 = vector.broadcast %40 : vector<2x1xf32> to vector<2x128xf32>
    %42 = arith.subf %38, %41 : vector<2x128xf32>
    %43 = math.exp %42 : vector<2x128xf32>
    %cst_15 = arith.constant dense<0.000000e+00> : vector<2xf32>
    %44 = vector.multi_reduction <add>, %43, %cst_15 [1] : vector<2x128xf32> to vector<2xf32>
    %45 = vector.shape_cast %44 : vector<2xf32> to vector<2x1xf32>
    %46 = tpu.reciprocal %45 {approx = true} : vector<2x1xf32> -> vector<2x1xf32>
    %47 = vector.broadcast %46 : vector<2x1xf32> to vector<2x128xf32>
    %48 = arith.mulf %43, %47 : vector<2x128xf32>
    %49 = arith.subf %48, %17 : vector<2x128xf32>
    %cst_16 = arith.constant dense<0.000000e+00> : vector<2x1024xf32>
    %50 = tpu.matmul %49, %1, %cst_16 {dimension_numbers = #tpu.dot_dimension_numbers<[1], [1], [0], [0], [0, 0, 1, 0], [], []>} : vector<2x128xf32>, vector<1024x128xf32>, vector<2x1024xf32> -> vector<2x1024xf32>
    %51 = arith.mulf %50, %50 : vector<2x1024xf32>
    %cst_17 = arith.constant dense<0.000000e+00> : vector<2xf32>
    %52 = vector.multi_reduction <add>, %51, %cst_17 [1] : vector<2x1024xf32> to vector<2xf32>
    %53 = vector.shape_cast %52 : vector<2xf32> to vector<2x1xf32>
    %54 = math.sqrt %53 : vector<2x1xf32>
    %cst_18 = arith.constant 9.99999993E-9 : f32
    %55 = vector.broadcast %cst_18 : f32 to vector<2x1xf32>
    %56 = arith.addf %54, %55 : vector<2x1xf32>
    %57 = tpu.reciprocal %56 {approx = true} : vector<2x1xf32> -> vector<2x1xf32>
    %58 = vector.broadcast %57 : vector<2x1xf32> to vector<2x1024xf32>
    %59 = arith.mulf %50, %58 : vector<2x1024xf32>
    %cst_19 = arith.constant 1.000000e+00 : f32
    %60 = vector.broadcast %cst_19 : f32 to vector<2x1024xf32>
    %61 = arith.mulf %60, %59 : vector<2x1024xf32>
    %62 = arith.addf %0, %61 : vector<2x1024xf32>
    %cst_20 = arith.constant dense<0.000000e+00> : vector<2x128xf32>
    %63 = tpu.matmul %62, %1, %cst_20 {dimension_numbers = #tpu.dot_dimension_numbers<[1], [0], [0], [1], [0, 0, 1, 1], [], []>} : vector<2x1024xf32>, vector<1024x128xf32>, vector<2x128xf32> -> vector<2x128xf32>
    %64 = vector.broadcast %2 : vector<1x128xf32> to vector<2x128xf32>
    %65 = arith.addf %63, %64 : vector<2x128xf32>
    %cst_21 = arith.constant dense<0xFF800000> : vector<2xf32>
    %66 = vector.multi_reduction <maximumf>, %65, %cst_21 [1] : vector<2x128xf32> to vector<2xf32>
    %67 = vector.shape_cast %66 : vector<2xf32> to vector<2x1xf32>
    %68 = vector.broadcast %67 : vector<2x1xf32> to vector<2x128xf32>
    %69 = arith.subf %65, %68 : vector<2x128xf32>
    %70 = math.exp %69 : vector<2x128xf32>
    %cst_22 = arith.constant dense<0.000000e+00> : vector<2xf32>
    %71 = vector.multi_reduction <add>, %70, %cst_22 [1] : vector<2x128xf32> to vector<2xf32>
    %72 = vector.shape_cast %71 : vector<2xf32> to vector<2x1xf32>
    %73 = math.log %72 : vector<2x1xf32>
    %74 = vector.broadcast %73 : vector<2x1xf32> to vector<2x128xf32>
    %75 = arith.subf %69, %74 : vector<2x128xf32>
    %76 = arith.mulf %17, %75 : vector<2x128xf32>
    %77 = vector.shape_cast %76 : vector<2x128xf32> to vector<1x2x128xf32>
    %cst_23 = arith.constant dense<0.000000e+00> : vector<1xf32>
    %78 = vector.multi_reduction <add>, %77, %cst_23 [1, 2] : vector<1x2x128xf32> to vector<1xf32>
    %79 = vector.shape_cast %78 : vector<1xf32> to vector<1x1x1xf32>
    %80 = vector.extract %79[0, 0, 0] : f32 from vector<1x1x1xf32>
    %81 = arith.subf %22, %80 : f32
    %cst_24 = arith.constant 2.000000e+00 : f32
    %82 = arith.divf %81, %cst_24 : f32
    %c0_25 = arith.constant 0 : index
    %c0_26 = arith.constant 0 : index
    %83 = memref.load %arg4[%c0_25, %c0_26] : memref<1x1xf32, #tpu.memory_space<smem>>
    memref.store %82, %arg4[%c0_25, %c0_26] : memref<1x1xf32, #tpu.memory_space<smem>>
    return
  }
}

</mosaic_0001>

<bundles_post_ra>
// kernel: tpu_custom_call.1
= control target key start
LH: loop header
LB: loop body
LE: loop exit
PB: predicated region body
PF: predicated region fallthrough
CT: control target
= control target key end

     0   :  { %9 = vsyncpa [#allocation3], 0  ;;  %s3312_s0 = inlined_call_operand.hbm [shape: f32[2,1024], index: 0, kind: input, shape index: {}]   ;;  %s3313_s1 = inlined_call_operand.hbm [shape: f32[1024,128], index: 1, kind: input, shape index: {}]   ;;  %s3314_s2 = inlined_call_operand.vmem [shape: f32[1,128], index: 2, kind: input, shape index: {}]   ;;  %s3315_s3 = inlined_call_operand.hbm [shape: f32[2,1024], index: 3, kind: input, shape index: {}]   ;;  %s3316_s4 = inlined_call_operand.hbm [shape: f32[1,1], index: 4, kind: output, shape index: {}]  }
   0x1   :  { %10 = vsyncpa [#allocation6], 0 }
   0x2   :  { %11 = vsyncpa [#allocation4], 0  ;;  %s2504_s15 = smov [#allocation5]  }
   0x3   :  { %s27_s16 = sshll.u32 %s2504_s15, 4  ;;  %s28_s16 = int_to_ptr.vmem [resolvable:$true] %s27_s16 }
   0x4   :  { %s2438_s17 = scalar_lea.vmem %s28_s16, 16384  ;;  %p2443_p1 = scmp.lt.s32.totalorder %s28_s16, %s28_s16 }
   0x5   :  { %p2439_p0 = scmp.ne.s32.totalorder %s28_s16, %s2438_s17  ;;  %p2444_p2 = scmp.lt.s32.totalorder %s2438_s17, %s2438_s17 }
   0x7   :  { %p2445_p3 = por %p2444_p2, %p2443_p1 }
   0x9   :  { %p2446_p4 = pnand %p2445_p3, %p2439_p0 }
   0xb   :  { %2449 = shalt.err (!%p2446_p4)
}
   0xc   :  { %s2505_s18 = smov 128   ;;  %s2506_s19 = smov 8  }
   0xd   :  { %33 = dma.hbm_to_vmem [thread:$0]  %s3313_s1, 16384, %s28_s16, [#allocation6], %s2505_s18, %s2505_s18, %s2506_s19  }
   0xe   :  { %s2507_s22 = smov [#allocation2]   ;;  %s2508_s24 = smov [#allocation7]  }
   0xf   :  { %s18_s23 = sshll.u32 %s2507_s22, 4  ;;  %s42_s25 = sshll.u32 %s2508_s24, 4  ;;  %s19_s23 = int_to_ptr.vmem [resolvable:$true] %s18_s23  ;;  %s43_s25 = int_to_ptr.vmem [resolvable:$true] %s42_s25 }
  0x10   :  { %s2458_s26 = scalar_lea.vmem %s19_s23, 256  ;;  %p2463_p6 = scmp.lt.s32.totalorder %s19_s23, %s19_s23 }
  0x11   :  { %p2459_p5 = scmp.ne.s32.totalorder %s19_s23, %s2458_s26  ;;  %p2464_p7 = scmp.lt.s32.totalorder %s2458_s26, %s2458_s26 }
  0x13   :  { %p2465_p8 = por %p2464_p7, %p2463_p6 }
  0x15   :  { %p2466_p9 = pnand %p2465_p8, %p2459_p5 }
  0x17   :  { %2469 = shalt.err (!%p2466_p9)
}
  0x18   :  { %21 = dma.hbm_to_vmem [thread:$0]  %s3312_s0, 256, %s19_s23, [#allocation3]  }
  0x19   :  { %s2478_s29 = scalar_lea.vmem %s43_s25, 256  ;;  %p2483_p11 = scmp.lt.s32.totalorder %s43_s25, %s43_s25 }
  0x1a   :  { %p2479_p10 = scmp.ne.s32.totalorder %s43_s25, %s2478_s29  ;;  %p2484_p12 = scmp.lt.s32.totalorder %s2478_s29, %s2478_s29 }
  0x1c   :  { %p2485_p13 = por %p2484_p12, %p2483_p11 }
  0x1e   :  { %p2486_p0 = pnand %p2485_p13, %p2479_p10 }
  0x20   :  { %2489 = shalt.err (!%p2486_p0)
}
  0x21   :  { %45 = dma.hbm_to_vmem [thread:$0]  %s3315_s3, 256, %s43_s25, [#allocation6]  }
  0x22   :  { %2498 = dma.done.wait [#allocation3], 256  }
  0x23   :  { %2499 = vsyncadd [#allocation3], 4294967040 }
  0x24   :  { %2500 = dma.done.wait [#allocation6], 16640  }
  0x25   :  { %2501 = vsyncadd [#allocation6], 4294950656  ;;  %v2546_v0 = vld [vmem:[#allocation5 + $0xf8] sm:$0xff]  ;;  %v2550_v2 = vld [vmem:[#allocation5 + $0xf0] sm:$0xff]  ;;  %v2509_v13 = vmov 1983009808   ;;  %v198_v15 = vlaneseq }
  0x26   :  { %v2548_v1 = vld [vmem:[#allocation5 + $0x78] sm:$0xff]  ;;  %1708 = vmatprep.subr.mxu0 %v2546_v0  ;;  %v2555_v4 = vld [vmem:[#allocation5 + $0x70] sm:$0xff]  ;;  %v2561_v6 = vld [vmem:[#allocation5 + $0xe8] sm:$0xff]  ;;  %v196_v14 = vunpack.c.l.s4 %v2509_v13  ;;  %vm516_vm0 = vcmask 1041408   ;;  %s2511_s8 = smov [#allocation8]  }
  0x27   :  { %v2553_v3 = vld [vmem:[#allocation5 + $0x1f8] sm:$0xff]  ;;  %1709 = vmatpush3.msra.mxu0 %v2548_v1  ;;  %v2563_v7 = vld [vmem:[#allocation5 + $0x1f0] sm:$0xff]  ;;  %v2567_v8 = vld [vmem:[#allocation5 + $0x68] sm:$0xff]  ;;  %v2603_v25 = vshrl.u32 %v198_v15, 7 }
  0x28   :  { %v2557_v5 = vld [vmem:[#allocation5 + $0x178] sm:$0xff]  ;;  %1743 = vmatprep.subr.mxu1 %v2553_v3  ;;  %1710 = vmatprep.subr.mxu0 %v2550_v2  ;;  %v2569_v9 = vld [vmem:[#allocation5 + $0x170] sm:$0xff]  ;;  %v2571_v10 = vld [vmem:[#allocation5 + $0x1e8] sm:$0xff]  ;;  %v197_v24 = vunpack.c.0.s8 %v196_v14 }
  0x29   :  { %1744 = vmatpush3.msra.mxu1 %v2557_v5  ;;  %1711 = vmatpush3.msra.mxu0 %v2555_v4  ;;  %v2575_v11 = vld [vmem:[#allocation5 + $0xe0] sm:$0xff]  ;;  %v2577_v12 = vld [vmem:[#allocation5 + $0x168] sm:$0xff]  ;;  %v2587_v18 = vld [vmem:[#allocation5 + $0xd8] sm:$0xff]  ;;  %3481 = vst [vmem:[#allocation12_spill] sm:$0xff] %v2603_v25 }
  0x2a   :  { %1745 = vmatprep.subr.mxu1 %v2563_v7  ;;  %1712 = vmatprep.subr.mxu0 %v2561_v6  ;;  %v2581_v16 = vld [vmem:[#allocation5 + $0x60] sm:$0xff]  ;;  %v2593_v20 = vld [vmem:[#allocation5 + $0x58] sm:$0xff]  ;;  %v2599_v22 = vld [vmem:[#allocation5 + $0xd0] sm:$0xff]  ;;  %v2632_v35 = vsub.s32 %v197_v24, %v2603_v25 }
  0x2b   :  { %1746 = vmatpush3.msra.mxu1 %v2569_v9  ;;  %v2583_v17 = vld [vmem:[#allocation5 + $0x1e0] sm:$0xff]  ;;  %1713 = vmatpush3.msra.mxu0 %v2567_v8  ;;  %v2595_v21 = vld [vmem:[#allocation5 + $0x1d8] sm:$0xff]  ;;  %v2607_v26 = vld [vmem:[#allocation5 + $0x50] sm:$0xff] }
  0x2c   :  { %1747 = vmatprep.subr.mxu1 %v2571_v10  ;;  %v2589_v19 = vld [vmem:[#allocation5 + $0x160] sm:$0xff]  ;;  %1714 = vmatprep.subr.mxu0 %v2575_v11  ;;  %v2601_v23 = vld [vmem:[#allocation5 + $0x158] sm:$0xff]  ;;  %v2609_v27 = vld [vmem:[#allocation5 + $0x1d0] sm:$0xff]  ;;  %3482 = vst [vmem:[#allocation13_spill] sm:$0xff] %v2632_v35 }
  0x2d   :  { %1748 = vmatpush3.msra.mxu1 %v2577_v12  ;;  %1715 = vmatpush3.msra.mxu0 %v2581_v16  ;;  %v2613_v28 = vld [vmem:[#allocation5 + $0xc8] sm:$0xff]  ;;  %v2615_v29 = vld [vmem:[#allocation5 + $0x150] sm:$0xff]  ;;  %v2625_v32 = vld [vmem:[#allocation5 + $0xc0] sm:$0xff] }
  0x2e   :  { %1749 = vmatprep.subr.mxu1 %v2583_v17  ;;  %1716 = vmatprep.subr.mxu0 %v2587_v18  ;;  %v2619_v30 = vld [vmem:[#allocation5 + $0x48] sm:$0xff]  ;;  %v2627_v33 = vld [vmem:[#allocation5 + $0x40] sm:$0xff]  ;;  %v2644_v39 = vld [vmem:[#allocation5 + $0xb8] sm:$0xff] }
  0x2f   :  { %1750 = vmatpush3.msra.mxu1 %v2589_v19  ;;  %1717 = vmatpush3.msra.mxu0 %v2593_v20  ;;  %v2621_v31 = vld [vmem:[#allocation5 + $0x1c8] sm:$0xff]  ;;  %v2636_v36 = vld [vmem:[#allocation5 + $0x1c0] sm:$0xff]  ;;  %3485 = vst [vmem:[#allocation16_spill] sm:$0xff] %v2644_v39  ;;  %v2654_v43 = vld [vmem:[#allocation5 + $0x38] sm:$0xff] }
  0x30   :  { %1751 = vmatprep.subr.mxu1 %v2595_v21  ;;  %1718 = vmatprep.subr.mxu0 %v2599_v22  ;;  %v2629_v34 = vld [vmem:[#allocation5 + $0x148] sm:$0xff]  ;;  %v2638_v37 = vld [vmem:[#allocation7] sm:$0xff]  ;;  %3486 = vst [vmem:[#allocation17_spill] sm:$0xff] %v2654_v43  ;;  %v2656_v44 = vld [vmem:[#allocation5 + $0x1b8] sm:$0xff] }
  0x31   :  { %1752 = vmatpush3.msra.mxu1 %v2601_v23  ;;  %1719 = vmatpush3.msra.mxu0 %v2607_v26  ;;  %3483 = vst [vmem:[#allocation14_spill] sm:$0xff] %v2638_v37  ;;  %v2640_v38 = vld [vmem:[#allocation7 + $0x8] sm:$0xff]  ;;  %v2646_v40 = vld [vmem:[#allocation5 + $0x140] sm:$0xff]  ;;  %v544_v41 = vmul.f32 %v2638_v37, %v2638_v37  ;;  %3487 = vst [vmem:[#allocation18_spill] sm:$0xff] %v2656_v44 }
  0x32   :  { %1753 = vmatprep.subr.mxu1 %v2609_v27  ;;  %1720 = vmatprep.subr.mxu0 %v2613_v28  ;;  %3484 = vst [vmem:[#allocation15_spill] sm:$0xff] %v2640_v38  ;;  %v545_v42 = vmul.f32 %v2640_v38, %v2640_v38  ;;  %v2660_v45 = vld [vmem:[#allocation5 + $0xb0] sm:$0xff]  ;;  %v2662_v46 = vld [vmem:[#allocation5 + $0x138] sm:$0xff]  ;;  %v2673_v52 = vld [vmem:[#allocation5 + $0xa8] sm:$0xff] }
  0x33   :  { %1754 = vmatpush3.msra.mxu1 %v2615_v29  ;;  %1721 = vmatpush3.msra.mxu0 %v2619_v30  ;;  %3488 = vst [vmem:[#allocation19_spill] sm:$0xff] %v2660_v45  ;;  %3489 = vst [vmem:[#allocation20_spill] sm:$0xff] %v2662_v46  ;;  %v548_v47 = vcombine.high %v544_v41, %v544_v41  ;;  %v555_v48 = vrot.slane %v544_v41, %v2632_v35  ;;  %v2667_v49 = vld [vmem:[#allocation5 + $0x30] sm:$0xff]  ;;  %v2682_v58 = vld [vmem:[#allocation5 + $0x28] sm:$0xff] }
  0x34   :  { %1755 = vmatprep.subr.mxu1 %v2621_v31  ;;  %1722 = vmatprep.subr.mxu0 %v2625_v32  ;;  %3490 = vst [vmem:[#allocation21_spill] sm:$0xff] %v2667_v49  ;;  %v2669_v50 = vld [vmem:[#allocation5 + $0x1b0] sm:$0xff]  ;;  %v565_v51 = vcombine.high %v545_v42, %v545_v42  ;;  %3492 = vst [vmem:[#allocation23_spill] sm:$0xff] %v2673_v52  ;;  %v572_v55 = vrot.slane %v545_v42, %v2632_v35  ;;  %v2684_v59 = vld [vmem:[#allocation5 + $0x1a8] sm:$0xff] }
  0x35   :  { %1756 = vmatpush3.msra.mxu1 %v2629_v34  ;;  %1723 = vmatpush3.msra.mxu0 %v2627_v33  ;;  %3491 = vst [vmem:[#allocation22_spill] sm:$0xff] %v2669_v50  ;;  %v562_v53 = vrot.slane %v548_v47, %v2632_v35  ;;  %v563_v54 = vcombine.high %v555_v48, %v555_v48  ;;  %v590_v56 = vsel %vm516_vm0, %v555_v48, 0.0  ;;  %v2678_v57 = vld [vmem:[#allocation5 + $0x130] sm:$0xff]  ;;  %3494 = vst [vmem:[#allocation25_spill] sm:$0xff] %v2682_v58  ;;  %v2690_v63 = vld [vmem:[#allocation5 + $0xa0] sm:$0xff] }
  0x36   :  { %1757 = vmatprep.subr.mxu1 %v2636_v36  ;;  %1724 = vmatprep.subr.mxu0 %v2644_v39  ;;  %3493 = vst [vmem:[#allocation24_spill] sm:$0xff] %v2678_v57  ;;  %3495 = vst [vmem:[#allocation26_spill] sm:$0xff] %v2684_v59  ;;  %v2692_v13 = vld [vmem:[#allocation5 + $0x128] sm:$0xff]  ;;  %v2696_v15 = vld [vmem:[#allocation5 + $0x20] sm:$0xff]  ;;  %v579_v42 = vrot.slane %v565_v51, %v2632_v35  ;;  %v580_v47 = vcombine.high %v572_v55, %v572_v55  ;;  %v597_v51 = vsel %vm516_vm0, %v572_v55, 0.0 }
  0x37   :  { %1758 = vmatpush3.msra.mxu1 %v2646_v40  ;;  %1725 = vmatpush3.msra.mxu0 %v2654_v43  ;;  %v564_v60 = vcombine.high %v562_v53, %v562_v53  ;;  %v591_v61 = vsel %vm516_vm0, %v563_v54, 0.0  ;;  %v593_v62 = vsel %vm516_vm0, %v562_v53, 0.0  ;;  %3496 = vst [vmem:[#allocation27_spill] sm:$0xff] %v2690_v63  ;;  %3497 = vst [vmem:[#allocation28_spill] sm:$0xff] %v2692_v13  ;;  %v2698_v24 = vld [vmem:[#allocation5 + $0x1a0] sm:$0xff]  ;;  %v2700_v41 = vld [vmem:[#allocation2] sm:$0xff] }
  0x38   :  { %1759 = vmatprep.subr.mxu1 %v2656_v44  ;;  %1726 = vmatprep.subr.mxu0 %v2660_v45  ;;  %v592_v14 = vadd.f32 %v591_v61, %v590_v56  ;;  %3498 = vst [vmem:[#allocation29_spill] sm:$0xff] %v2696_v15  ;;  %3499 = vst [vmem:[#allocation30_spill] sm:$0xff] %v2698_v24  ;;  %v2706_v53 = vld [vmem:[#allocation5 + $0x98] sm:$0xff]  ;;  %v2708_v54 = vld [vmem:[#allocation5 + $0x120] sm:$0xff] }
  0x39   :  { %1760 = vmatpush3.msra.mxu1 %v2662_v46  ;;  %1727 = vmatpush3.msra.mxu0 %v2667_v49  ;;  %3500 = vst [vmem:[#allocation31_spill] sm:$0xff] %v2700_v41  ;;  %v595_v48 = vsel %vm516_vm0, %v564_v60, 0.0  ;;  %3501 = vst [vmem:[#allocation32_spill] sm:$0xff] %v2706_v53  ;;  %v2712_v61 = vld [vmem:[#allocation5 + $0x18] sm:$0xff]  ;;  %v2719_v60 = vld [vmem:[#allocation5 + $0x90] sm:$0xff] }
  0x3a   :  { %1761 = vmatprep.subr.mxu1 %v2669_v50  ;;  %1728 = vmatprep.subr.mxu0 %v2673_v52  ;;  %3502 = vst [vmem:[#allocation33_spill] sm:$0xff] %v2708_v54  ;;  %v594_v56 = vadd.f32 %v593_v62, %v592_v14  ;;  %3503 = vst [vmem:[#allocation34_spill] sm:$0xff] %v2712_v61  ;;  %v2714_v38 = vld [vmem:[#allocation5 + $0x198] sm:$0xff]  ;;  %v201_v62 = vrot.slane %v2700_v41, %v2632_v35  ;;  %v2729_v55 = vld [vmem:[#allocation5 + $0x10] sm:$0xff] }
  0x3b   :  { %1762 = vmatpush3.msra.mxu1 %v2678_v57  ;;  %1729 = vmatpush3.msra.mxu0 %v2682_v58  ;;  %3504 = vst [vmem:[#allocation35_spill] sm:$0xff] %v2714_v38  ;;  %3505 = vst [vmem:[#allocation36_spill] sm:$0xff] %v2719_v60  ;;  %v2721_v37 = vld [vmem:[#allocation5 + $0x118] sm:$0xff]  ;;  %v194_v14 = vcombine.high %v2700_v41, %v2700_v41  ;;  %v2744_v41 = vld [vmem:[#allocation5 + $0x188] sm:$0xff] }
  0x3c   :  { %1763 = vmatprep.subr.mxu1 %v2684_v59  ;;  %1730 = vmatprep.subr.mxu0 %v2690_v63  ;;  %3506 = vst [vmem:[#allocation37_spill] sm:$0xff] %v2721_v37  ;;  %v596_v25 = vadd.f32 %v595_v48, %v594_v56  ;;  %3507 = vst [vmem:[#allocation38_spill] sm:$0xff] %v2729_v55  ;;  %v2736_v59 = vld [vmem:[#allocation5 + $0x88] sm:$0xff]  ;;  %v2738_v63 = vld [vmem:[#allocation5 + $0x110] sm:$0xff] }
  0x3d   :  { %1764 = vmatpush3.msra.mxu1 %v2692_v13  ;;  %1731 = vmatpush3.msra.mxu0 %v2696_v15  ;;  %v2731_v13 = vld [vmem:[#allocation5 + $0x190] sm:$0xff]  ;;  %v599_v15 = vsel %vm516_vm0, %v580_v47, 0.0  ;;  %3509 = vst [vmem:[#allocation40_spill] sm:$0xff] %v2736_v59  ;;  %3510 = vst [vmem:[#allocation41_spill] sm:$0xff] %v2738_v63  ;;  %v2742_v56 = vld [vmem:[#allocation5 + $0x8] sm:$0xff] }
  0x3e   :  { %1765 = vmatprep.subr.mxu1 %v2698_v24  ;;  %1732 = vmatprep.subr.mxu0 %v2706_v53  ;;  %3508 = vst [vmem:[#allocation39_spill] sm:$0xff] %v2731_v13  ;;  %v581_v24 = vcombine.high %v579_v42, %v579_v42  ;;  %v598_v48 = vadd.f32 %v597_v51, %v596_v25  ;;  %3511 = vst [vmem:[#allocation42_spill] sm:$0xff] %v2742_v56  ;;  %v2749_v47 = vld [vmem:[#allocation5 + $0x80] sm:$0xff] }
  0x3f   :  { %1766 = vmatpush3.msra.mxu1 %v2708_v54  ;;  %1733 = vmatpush3.msra.mxu0 %v2712_v61  ;;  %3512 = vst [vmem:[#allocation43_spill] sm:$0xff] %v2744_v41  ;;  %v601_v54 = vsel %vm516_vm0, %v579_v42, 0.0  ;;  %3513 = vst [vmem:[#allocation44_spill] sm:$0xff] %v2749_v47  ;;  %v209_v61 = vcombine.high %v201_v62, %v201_v62  ;;  %v208_v25 = vrot.slane %v194_v14, %v2632_v35  ;;  %v2770_v14 = vld [vmem:[#allocation5 + $0x278] sm:$0xff] }
  0x40   :  { %1767 = vmatprep.subr.mxu1 %v2714_v38  ;;  %1734 = vmatprep.subr.mxu0 %v2719_v60  ;;  %v2751_v38 = vld [vmem:[#allocation5 + $0x108] sm:$0xff]  ;;  %v600_v51 = vadd.f32 %v599_v15, %v598_v48  ;;  %v603_v42 = vsel %vm516_vm0, %v581_v24, 0.0  ;;  %v2767_v15 = vld [vmem:[#allocation5 + $0x100] sm:$0xff]  ;;  %3519 = vst [vmem:[#allocation50_spill] sm:$0xff] %v2770_v14 }
  0x41   :  { %1768 = vmatpush3.msra.mxu1 %v2721_v37  ;;  %1735 = vmatpush3.msra.mxu0 %v2729_v55  ;;  %3514 = vst [vmem:[#allocation45_spill] sm:$0xff] %v2751_v38  ;;  %v2756_v37 = vld [vmem:[#allocation5] sm:$0xff]  ;;  %v2763_v55 = vld [vmem:[#allocation5 + $0x2f8] sm:$0xff]  ;;  %3518 = vst [vmem:[#allocation49_spill] sm:$0xff] %v2767_v15  ;;  %v210_v24 = vcombine.high %v208_v25, %v208_v25 }
  0x42   :  { %1769 = vmatprep.subr.mxu1 %v2731_v13  ;;  %1736 = vmatprep.subr.mxu0 %v2736_v59  ;;  %3515 = vst [vmem:[#allocation46_spill] sm:$0xff] %v2756_v37  ;;  %v2761_v13 = vld [vmem:[#allocation5 + $0x180] sm:$0xff]  ;;  %3517 = vst [vmem:[#allocation48_spill] sm:$0xff] %v2763_v55  ;;  %v602_v60 = vadd.f32 %v601_v54, %v600_v51  ;;  %v2777_v54 = vld [vmem:[#allocation5 + $0x3f8] sm:$0xff] }
  0x43   :  { %1770 = vmatpush3.msra.mxu1 %v2738_v63  ;;  %1737 = vmatpush3.msra.mxu0 %v2742_v56  ;;  %3516 = vst [vmem:[#allocation47_spill] sm:$0xff] %v2761_v13  ;;  %3521 = vst [vmem:[#allocation52_spill] sm:$0xff] %v2777_v54  ;;  %v2780_v51 = vld [vmem:[#allocation5 + $0x270] sm:$0xff] }
  0x44   :  { %1771 = vmatprep.subr.mxu1 %v2744_v41  ;;  %1738 = vmatprep.subr.mxu0 %v2749_v47  ;;  %v604_v48 = vadd.f32 %v603_v42, %v602_v60  ;;  %v2774_v41 = vld [vmem:[#allocation5 + $0x2f0] sm:$0xff]  ;;  %3522 = vst [vmem:[#allocation53_spill] sm:$0xff] %v2780_v51  ;;  %v2785_v60 = vld [vmem:[#allocation5 + $0x2e8] sm:$0xff] }
  0x45   :  { %1772 = vmatpush3.msra.mxu1 %v2751_v38  ;;  %1739 = vmatpush3.msra.mxu0 %v2756_v37  ;;  %3520 = vst [vmem:[#allocation51_spill] sm:$0xff] %v2774_v41  ;;  %3524 = vst [vmem:[#allocation55_spill] sm:$0xff] %v2785_v60  ;;  %v2787_v42 = vld [vmem:[#allocation5 + $0x3f0] sm:$0xff] }
  0x46   :  { %300 = vmatprep.mubr.f32.mxu0 %v209_v61  ;;  %1773 = vmatprep.subr.mxu1 %v2761_v13  ;;  %v2782_v61 = vld [vmem:[#allocation5 + $0x378] sm:$0xff]  ;;  %3525 = vst [vmem:[#allocation56_spill] sm:$0xff] %v2787_v42 }
  0x47   :  { %1778 = vmatprep.subr.mxu0 %v2763_v55  ;;  %301 = vmatmul.mubr.f32.vlgmr.msra.gmra.mxu0 %v201_v62  ;;  %3523 = vst [vmem:[#allocation54_spill] sm:$0xff] %v2782_v61  ;;  %v2790_v62 = vld [vmem:[#allocation5 + $0x268] sm:$0xff] }
  0x48   :  { %1774 = vmatpush3.msra.mxu1 %v2767_v15  ;;  %605 = vadd.xlane.f32.xlu0 %v604_v48  ;;  %3526 = vst [vmem:[#allocation57_spill] sm:$0xff] %v2790_v62  ;;  %v2792_v15 = vld [vmem:[#allocation5 + $0x370] sm:$0xff]  ;;  %v2796_v48 = vld [vmem:[#allocation5 + $0x2e0] sm:$0xff] }
  0x49   :  { %1779 = vmatpush3.msra.mxu0 %v2770_v14  ;;  %370 = vmatprep.mubr.f32.mxu1 %v210_v24  ;;  %3527 = vst [vmem:[#allocation58_spill] sm:$0xff] %v2792_v15  ;;  %3528 = vst [vmem:[#allocation59_spill] sm:$0xff] %v2796_v48  ;;  %v2798_v24 = vld [vmem:[#allocation5 + $0x3e8] sm:$0xff] }
  0x4a   :  { %1780 = vmatprep.subr.mxu0 %v2774_v41  ;;  %1813 = vmatprep.subr.mxu1 %v2777_v54  ;;  %3529 = vst [vmem:[#allocation60_spill] sm:$0xff] %v2798_v24  ;;  %v2802_v41 = vld [vmem:[#allocation5 + $0x260] sm:$0xff]  ;;  %v2804_v14 = vld [vmem:[#allocation5 + $0x368] sm:$0xff]  ;;  %v2906_v54 = vld [vmem:[#allocation5 + $0x298] sm:$0xff] }
  0x4b   :  { %371 = vmatmul.mubr.f32.vlgmr.msra.gmra.mxu1 %v208_v25  ;;  %1781 = vmatpush3.msra.mxu0 %v2780_v51  ;;  %3530 = vst [vmem:[#allocation61_spill] sm:$0xff] %v2802_v41  ;;  %3531 = vst [vmem:[#allocation62_spill] sm:$0xff] %v2804_v14  ;;  %v2808_v25 = vld [vmem:[#allocation5 + $0x2d8] sm:$0xff]  ;;  %v2810_v51 = vld [vmem:[#allocation5 + $0x3e0] sm:$0xff] }
  0x4c   :  { %1814 = vmatpush3.msra.mxu1 %v2782_v61  ;;  %1782 = vmatprep.subr.mxu0 %v2785_v60  ;;  %3532 = vst [vmem:[#allocation63_spill] sm:$0xff] %v2808_v25  ;;  %3533 = vst [vmem:[#allocation64_spill] sm:$0xff] %v2810_v51  ;;  %v2814_v61 = vld [vmem:[#allocation5 + $0x258] sm:$0xff]  ;;  %v2816_v60 = vld [vmem:[#allocation5 + $0x360] sm:$0xff] }
  0x4d   :  { %1815 = vmatprep.subr.mxu1 %v2787_v42  ;;  %1783 = vmatpush3.msra.mxu0 %v2790_v62  ;;  %3534 = vst [vmem:[#allocation65_spill] sm:$0xff] %v2814_v61  ;;  %3535 = vst [vmem:[#allocation66_spill] sm:$0xff] %v2816_v60  ;;  %v2820_v42 = vld [vmem:[#allocation5 + $0x2d0] sm:$0xff]  ;;  %v2822_v62 = vld [vmem:[#allocation5 + $0x3d8] sm:$0xff] }
  0x4e   :  { %1816 = vmatpush3.msra.mxu1 %v2792_v15  ;;  %1784 = vmatprep.subr.mxu0 %v2796_v48  ;;  %3536 = vst [vmem:[#allocation67_spill] sm:$0xff] %v2820_v42  ;;  %3537 = vst [vmem:[#allocation68_spill] sm:$0xff] %v2822_v62  ;;  %v2826_v15 = vld [vmem:[#allocation5 + $0x250] sm:$0xff]  ;;  %v2828_v48 = vld [vmem:[#allocation5 + $0x358] sm:$0xff] }
  0x4f   :  { %1817 = vmatprep.subr.mxu1 %v2798_v24  ;;  %1785 = vmatpush3.msra.mxu0 %v2802_v41  ;;  %3538 = vst [vmem:[#allocation69_spill] sm:$0xff] %v2826_v15  ;;  %3539 = vst [vmem:[#allocation70_spill] sm:$0xff] %v2828_v48  ;;  %v2832_v24 = vld [vmem:[#allocation5 + $0x2c8] sm:$0xff]  ;;  %v2834_v41 = vld [vmem:[#allocation5 + $0x3d0] sm:$0xff] }
  0x50   :  { %1818 = vmatpush3.msra.mxu1 %v2804_v14  ;;  %1786 = vmatprep.subr.mxu0 %v2808_v25  ;;  %3540 = vst [vmem:[#allocation71_spill] sm:$0xff] %v2832_v24  ;;  %3541 = vst [vmem:[#allocation72_spill] sm:$0xff] %v2834_v41  ;;  %v2838_v14 = vld [vmem:[#allocation5 + $0x248] sm:$0xff]  ;;  %v2840_v25 = vld [vmem:[#allocation5 + $0x350] sm:$0xff] }
  0x51   :  { %1819 = vmatprep.subr.mxu1 %v2810_v51  ;;  %1787 = vmatpush3.msra.mxu0 %v2814_v61  ;;  %3542 = vst [vmem:[#allocation73_spill] sm:$0xff] %v2838_v14  ;;  %3543 = vst [vmem:[#allocation74_spill] sm:$0xff] %v2840_v25  ;;  %v2844_v51 = vld [vmem:[#allocation5 + $0x2c0] sm:$0xff]  ;;  %v2846_v61 = vld [vmem:[#allocation5 + $0x3c8] sm:$0xff] }
  0x52   :  { %1820 = vmatpush3.msra.mxu1 %v2816_v60  ;;  %1788 = vmatprep.subr.mxu0 %v2820_v42  ;;  %3544 = vst [vmem:[#allocation75_spill] sm:$0xff] %v2844_v51  ;;  %3545 = vst [vmem:[#allocation76_spill] sm:$0xff] %v2846_v61  ;;  %v2850_v60 = vld [vmem:[#allocation5 + $0x240] sm:$0xff]  ;;  %v2852_v42 = vld [vmem:[#allocation5 + $0x348] sm:$0xff] }
  0x53   :  { %1821 = vmatprep.subr.mxu1 %v2822_v62  ;;  %1789 = vmatpush3.msra.mxu0 %v2826_v15  ;;  %3546 = vst [vmem:[#allocation77_spill] sm:$0xff] %v2850_v60  ;;  %3547 = vst [vmem:[#allocation78_spill] sm:$0xff] %v2852_v42  ;;  %v2856_v62 = vld [vmem:[#allocation5 + $0x2b8] sm:$0xff]  ;;  %v2858_v15 = vld [vmem:[#allocation5 + $0x3c0] sm:$0xff] }
  0x54   :  { %1822 = vmatpush3.msra.mxu1 %v2828_v48  ;;  %1790 = vmatprep.subr.mxu0 %v2832_v24  ;;  %3548 = vst [vmem:[#allocation79_spill] sm:$0xff] %v2856_v62  ;;  %3549 = vst [vmem:[#allocation80_spill] sm:$0xff] %v2858_v15  ;;  %v2862_v48 = vld [vmem:[#allocation5 + $0x238] sm:$0xff]  ;;  %v2864_v24 = vld [vmem:[#allocation5 + $0x340] sm:$0xff] }
  0x55   :  { %1823 = vmatprep.subr.mxu1 %v2834_v41  ;;  %1791 = vmatpush3.msra.mxu0 %v2838_v14  ;;  %3550 = vst [vmem:[#allocation81_spill] sm:$0xff] %v2862_v48  ;;  %3551 = vst [vmem:[#allocation82_spill] sm:$0xff] %v2864_v24  ;;  %v2868_v41 = vld [vmem:[#allocation5 + $0x2b0] sm:$0xff]  ;;  %v2870_v14 = vld [vmem:[#allocation5 + $0x3b8] sm:$0xff] }
  0x56   :  { %1824 = vmatpush3.msra.mxu1 %v2840_v25  ;;  %1792 = vmatprep.subr.mxu0 %v2844_v51  ;;  %3552 = vst [vmem:[#allocation83_spill] sm:$0xff] %v2868_v41  ;;  %3553 = vst [vmem:[#allocation84_spill] sm:$0xff] %v2870_v14  ;;  %v2874_v25 = vld [vmem:[#allocation5 + $0x230] sm:$0xff]  ;;  %v2876_v51 = vld [vmem:[#allocation5 + $0x338] sm:$0xff] }
  0x57   :  { %1825 = vmatprep.subr.mxu1 %v2846_v61  ;;  %1793 = vmatpush3.msra.mxu0 %v2850_v60  ;;  %3554 = vst [vmem:[#allocation85_spill] sm:$0xff] %v2874_v25  ;;  %3555 = vst [vmem:[#allocation86_spill] sm:$0xff] %v2876_v51  ;;  %v2880_v61 = vld [vmem:[#allocation5 + $0x2a8] sm:$0xff]  ;;  %v2882_v60 = vld [vmem:[#allocation5 + $0x3b0] sm:$0xff] }
  0x58   :  { %1826 = vmatpush3.msra.mxu1 %v2852_v42  ;;  %1794 = vmatprep.subr.mxu0 %v2856_v62  ;;  %3556 = vst [vmem:[#allocation87_spill] sm:$0xff] %v2880_v61  ;;  %3557 = vst [vmem:[#allocation88_spill] sm:$0xff] %v2882_v60  ;;  %v2886_v42 = vld [vmem:[#allocation5 + $0x228] sm:$0xff]  ;;  %v2888_v62 = vld [vmem:[#allocation5 + $0x330] sm:$0xff] }
  0x59   :  { %1827 = vmatprep.subr.mxu1 %v2858_v15  ;;  %1795 = vmatpush3.msra.mxu0 %v2862_v48  ;;  %3558 = vst [vmem:[#allocation89_spill] sm:$0xff] %v2886_v42  ;;  %3559 = vst [vmem:[#allocation90_spill] sm:$0xff] %v2888_v62  ;;  %v2890_v15 = vld [vmem:[#allocation2 + $0x8] sm:$0xff]  ;;  %v2894_v48 = vld [vmem:[#allocation5 + $0x2a0] sm:$0xff] }
  0x5a   :  { %1828 = vmatpush3.msra.mxu1 %v2864_v24  ;;  %1796 = vmatprep.subr.mxu0 %v2868_v41  ;;  %3560 = vst [vmem:[#allocation91_spill] sm:$0xff] %v2890_v15  ;;  %3561 = vst [vmem:[#allocation92_spill] sm:$0xff] %v2894_v48  ;;  %v2896_v24 = vld [vmem:[#allocation5 + $0x3a8] sm:$0xff]  ;;  %v2900_v41 = vld [vmem:[#allocation5 + $0x220] sm:$0xff]  ;;  %v218_v55 = vrot.slane %v2890_v15, %v2632_v35 }
  0x5b   :  { %1829 = vmatprep.subr.mxu1 %v2870_v14  ;;  %1797 = vmatpush3.msra.mxu0 %v2874_v25  ;;  %3562 = vst [vmem:[#allocation93_spill] sm:$0xff] %v2896_v24  ;;  %3563 = vst [vmem:[#allocation94_spill] sm:$0xff] %v2900_v41  ;;  %v2902_v14 = vld [vmem:[#allocation5 + $0x328] sm:$0xff]  ;;  %v2908_v25 = vld [vmem:[#allocation5 + $0x3a0] sm:$0xff] }
  0x5c   :  { %1830 = vmatpush3.msra.mxu1 %v2876_v51  ;;  %1798 = vmatprep.subr.mxu0 %v2880_v61  ;;  %3564 = vst [vmem:[#allocation95_spill] sm:$0xff] %v2902_v14  ;;  %3565 = vst [vmem:[#allocation96_spill] sm:$0xff] %v2906_v54  ;;  %v211_v51 = vcombine.high %v2890_v15, %v2890_v15  ;;  %v2916_v61 = vld [vmem:[#allocation5 + $0x320] sm:$0xff]  ;;  %v226_v15 = vcombine.high %v218_v55, %v218_v55 }
  0x5d   :  { %1831 = vmatprep.subr.mxu1 %v2882_v60  ;;  %1799 = vmatpush3.msra.mxu0 %v2886_v42  ;;  %3566 = vst [vmem:[#allocation97_spill] sm:$0xff] %v2908_v25  ;;  %v2914_v60 = vld [vmem:[#allocation5 + $0x218] sm:$0xff]  ;;  %3568 = vst [vmem:[#allocation99_spill] sm:$0xff] %v2916_v61 }
  0x5e   :  { %1832 = vmatpush3.msra.mxu1 %v2888_v62  ;;  %1800 = vmatprep.subr.mxu0 %v2894_v48  ;;  %3567 = vst [vmem:[#allocation98_spill] sm:$0xff] %v2914_v60  ;;  %v2920_v62 = vld [vmem:[#allocation5 + $0x290] sm:$0xff]  ;;  %v2922_v42 = vld [vmem:[#allocation5 + $0x398] sm:$0xff]  ;;  %v225_v13 = vrot.slane %v211_v51, %v2632_v35  ;;  %v2953_v51 = vld [vmem:[#allocation5 + $0x200] sm:$0xff] }
  0x5f   :  { %1833 = vmatprep.subr.mxu1 %v2896_v24  ;;  %1801 = vmatpush3.msra.mxu0 %v2900_v41  ;;  %3569 = vst [vmem:[#allocation100_spill] sm:$0xff] %v2922_v42  ;;  %v2928_v24 = vld [vmem:[#allocation5 + $0x210] sm:$0xff]  ;;  %v2930_v48 = vld [vmem:[#allocation5 + $0x318] sm:$0xff]  ;;  %3574 = vst [vmem:[#allocation105_spill] sm:$0xff] %v2953_v51 }
  0x60   :  { %1834 = vmatpush3.msra.mxu1 %v2902_v14  ;;  %1802 = vmatprep.subr.mxu0 %v2906_v54  ;;  %3570 = vst [vmem:[#allocation101_spill] sm:$0xff] %v2928_v24  ;;  %3571 = vst [vmem:[#allocation102_spill] sm:$0xff] %v2930_v48  ;;  %v2934_v14 = vld [vmem:[#allocation5 + $0x288] sm:$0xff]  ;;  %v2936_v41 = vld [vmem:[#allocation5 + $0x390] sm:$0xff] }
  0x61   :  { %1835 = vmatprep.subr.mxu1 %v2908_v25  ;;  %1803 = vmatpush3.msra.mxu0 %v2914_v60  ;;  %3572 = vst [vmem:[#allocation103_spill] sm:$0xff] %v2934_v14  ;;  %v2941_v54 = vld [vmem:[#allocation5 + $0x208] sm:$0xff]  ;;  %v2943_v25 = vld [vmem:[#allocation5 + $0x310] sm:$0xff]  ;;  %v2947_v60 = vld [vmem:[#allocation5 + $0x280] sm:$0xff] }
  0x62   :  { %1836 = vmatpush3.msra.mxu1 %v2916_v61  ;;  %1804 = vmatprep.subr.mxu0 %v2920_v62  ;;  %3573 = vst [vmem:[#allocation104_spill] sm:$0xff] %v2941_v54  ;;  %v2949_v61 = vld [vmem:[#allocation5 + $0x388] sm:$0xff] }
  0x63   :  { %1837 = vmatprep.subr.mxu1 %v2922_v42  ;;  %1805 = vmatpush3.msra.mxu0 %v2928_v24  ;;  %v2957_v42 = vld [vmem:[#allocation5 + $0x308] sm:$0xff]  ;;  %v227_v24 = vcombine.high %v225_v13, %v225_v13 }
  0x64   :  { %1838 = vmatpush3.msra.mxu1 %v2930_v48  ;;  %1806 = vmatprep.subr.mxu0 %v2934_v14  ;;  %v2961_v48 = vld [vmem:[#allocation5 + $0x380] sm:$0xff] }
  0x65   :  { %1839 = vmatprep.subr.mxu1 %v2936_v41  ;;  %1807 = vmatpush3.msra.mxu0 %v2941_v54  ;;  %v2964_v14 = vld [vmem:[#allocation5 + $0x300] sm:$0xff] }
  0x66   :  { %1840 = vmatpush3.msra.mxu1 %v2943_v25  ;;  %1808 = vmatprep.subr.mxu0 %v2947_v60 }
  0x67   :  { %1841 = vmatprep.subr.mxu1 %v2949_v61  ;;  %1809 = vmatpush3.msra.mxu0 %v2953_v51 }
  0x68   :  { %440 = vmatprep.mubr.f32.mxu0 %v226_v15  ;;  %1842 = vmatpush3.msra.mxu1 %v2957_v42  ;;  %v3577_v15 = vld [vmem:[#allocation29_spill] sm:$0xff] }
  0x69   :  { %441 = vmatmul.mubr.f32.vlgmr.msra.gmra.mxu0 %v218_v55  ;;  %1843 = vmatprep.subr.mxu1 %v2961_v48  ;;  %v3576_v55 = vld [vmem:[#allocation26_spill] sm:$0xff] }
  0x6a   :  { %510 = vmatprep.mubr.f32.mxu1 %v227_v24  ;;  %1844 = vmatpush3.msra.mxu1 %v2964_v14  ;;  %v3578_v24 = vld [vmem:[#allocation28_spill] sm:$0xff] }
  0x6b   :  { %1848 = vmatprep.subr.mxu0 %v2546_v0  ;;  %511 = vmatmul.mubr.f32.vlgmr.msra.gmra.mxu1 %v225_v13  ;;  %v3575_v13 = vld [vmem:[#allocation27_spill] sm:$0xff] }
  0x6c   :  { %1849 = vmatpush3.msra.mxu0 %v2548_v1  ;;  %1883 = vmatprep.subr.mxu1 %v2553_v3 }
  0x6d   :  { %1850 = vmatprep.subr.mxu0 %v2550_v2  ;;  %1884 = vmatpush3.msra.mxu1 %v2557_v5 }
  0x6e   :  { %1851 = vmatpush3.msra.mxu0 %v2555_v4  ;;  %1885 = vmatprep.subr.mxu1 %v2563_v7 }
  0x6f   :  { %1852 = vmatprep.subr.mxu0 %v2561_v6  ;;  %1886 = vmatpush3.msra.mxu1 %v2569_v9 }
  0x70   :  { %1853 = vmatpush3.msra.mxu0 %v2567_v8  ;;  %1887 = vmatprep.subr.mxu1 %v2571_v10 }
  0x71   :  { %1854 = vmatprep.subr.mxu0 %v2575_v11  ;;  %1888 = vmatpush3.msra.mxu1 %v2577_v12 }
  0x72   :  { %1855 = vmatpush3.msra.mxu0 %v2581_v16  ;;  %1889 = vmatprep.subr.mxu1 %v2583_v17 }
  0x73   :  { %1856 = vmatprep.subr.mxu0 %v2587_v18  ;;  %1890 = vmatpush3.msra.mxu1 %v2589_v19 }
  0x74   :  { %1857 = vmatpush3.msra.mxu0 %v2593_v20  ;;  %1891 = vmatprep.subr.mxu1 %v2595_v21 }
  0x75   :  { %1858 = vmatprep.subr.mxu0 %v2599_v22  ;;  %1892 = vmatpush3.msra.mxu1 %v2601_v23 }
  0x76   :  { %1859 = vmatpush3.msra.mxu0 %v2607_v26  ;;  %1893 = vmatprep.subr.mxu1 %v2609_v27 }
  0x77   :  { %1860 = vmatprep.subr.mxu0 %v2613_v28  ;;  %1894 = vmatpush3.msra.mxu1 %v2615_v29 }
  0x78   :  { %1861 = vmatpush3.msra.mxu0 %v2619_v30  ;;  %1895 = vmatprep.subr.mxu1 %v2621_v31 }
  0x79   :  { %1862 = vmatprep.subr.mxu0 %v2625_v32  ;;  %1896 = vmatpush3.msra.mxu1 %v2629_v34 }
  0x7a   :  { %1863 = vmatpush3.msra.mxu0 %v2627_v33  ;;  %1897 = vmatprep.subr.mxu1 %v2636_v36 }
  0x7b   :  { %1864 = vmatprep.subr.mxu0 %v2644_v39  ;;  %1898 = vmatpush3.msra.mxu1 %v2646_v40 }
  0x7c   :  { %1865 = vmatpush3.msra.mxu0 %v2654_v43  ;;  %1899 = vmatprep.subr.mxu1 %v2656_v44  ;;  %v3595_v44 = vld [vmem:[#allocation31_spill] sm:$0xff] }
  0x7d   :  { %1866 = vmatprep.subr.mxu0 %v2660_v45  ;;  %1900 = vmatpush3.msra.mxu1 %v2662_v46  ;;  %v3580_v45 = vld [vmem:[#allocation34_spill] sm:$0xff] }
  0x7e   :  { %1867 = vmatpush3.msra.mxu0 %v2667_v49  ;;  %1901 = vmatprep.subr.mxu1 %v2669_v50  ;;  %v3579_v49 = vld [vmem:[#allocation30_spill] sm:$0xff]  ;;  %v3582_v50 = vld [vmem:[#allocation36_spill] sm:$0xff] }
  0x7f   :  { %1868 = vmatprep.subr.mxu0 %v2673_v52  ;;  %1902 = vmatpush3.msra.mxu1 %v2678_v57  ;;  %v3581_v52 = vld [vmem:[#allocation33_spill] sm:$0xff]  ;;  %v3584_v57 = vld [vmem:[#allocation38_spill] sm:$0xff] }
  0x80   :  { %1869 = vmatpush3.msra.mxu0 %v2682_v58  ;;  %1903 = vmatprep.subr.mxu1 %v3576_v55  ;;  %v3583_v58 = vld [vmem:[#allocation35_spill] sm:$0xff] }
  0x81   :  { %1870 = vmatprep.subr.mxu0 %v3575_v13  ;;  %1904 = vmatpush3.msra.mxu1 %v3578_v24  ;;  %v3585_v13 = vld [vmem:[#allocation37_spill] sm:$0xff]  ;;  %v3593_v24 = vld [vmem:[#allocation14_spill] sm:$0xff]  ;;  %v3594_v55 = vld [vmem:[#allocation15_spill] sm:$0xff] }
  0x82   :  { %1871 = vmatpush3.msra.mxu0 %v3577_v15  ;;  %1905 = vmatprep.subr.mxu1 %v3579_v49  ;;  %v3586_v15 = vld [vmem:[#allocation39_spill] sm:$0xff] }
  0x83   :  { %1872 = vmatprep.subr.mxu0 %v2706_v53  ;;  %1906 = vmatpush3.msra.mxu1 %v3581_v52  ;;  %v3592_v52 = vld [vmem:[#allocation12_spill] sm:$0xff] }
  0x84   :  { %1873 = vmatpush3.msra.mxu0 %v3580_v45  ;;  %1907 = vmatprep.subr.mxu1 %v3583_v58  ;;  %v3587_v45 = vld [vmem:[#allocation43_spill] sm:$0xff] }
  0x85   :  { %1874 = vmatprep.subr.mxu0 %v3582_v50  ;;  %1908 = vmatpush3.msra.mxu1 %v3585_v13  ;;  %v3588_v50 = vld [vmem:[#allocation47_spill] sm:$0xff]  ;;  %v3590_v13 = vld [vmem:[#allocation49_spill] sm:$0xff] }
  0x86   :  { %1875 = vmatpush3.msra.mxu0 %v3584_v57  ;;  %1909 = vmatprep.subr.mxu1 %v3586_v15  ;;  %v3589_v57 = vld [vmem:[#allocation48_spill] sm:$0xff] }
  0x87   :  { %1876 = vmatprep.subr.mxu0 %v2736_v59  ;;  %1910 = vmatpush3.msra.mxu1 %v2738_v63  ;;  %v3591_v59 = vld [vmem:[#allocation52_spill] sm:$0xff] }
  0x88   :  { %1877 = vmatpush3.msra.mxu0 %v2742_v56  ;;  %1911 = vmatprep.subr.mxu1 %v3587_v45 }
  0x89   :  { %1878 = vmatprep.subr.mxu0 %v2749_v47  ;;  %1912 = vmatpush3.msra.mxu1 %v2751_v38  ;;  %v2510_v38 = vmov 269488144  }
  0x8a   :  { %1879 = vmatpush3.msra.mxu0 %v2756_v37  ;;  %1913 = vmatprep.subr.mxu1 %v3588_v50  ;;  %v618_v53 = vunpack.c.l.s4 %v2510_v38 }
  0x8b   :  { %1918 = vmatprep.subr.mxu0 %v3589_v57  ;;  %1914 = vmatpush3.msra.mxu1 %v3590_v13 }
  0x8c   :  { %1953 = vmatprep.subr.mxu1 %v3591_v59  ;;  %v619_v50 = vunpack.c.0.s8 %v618_v53  ;;  %v3600_v53 = vld [vmem:[#allocation54_spill] sm:$0xff] }
  0x8e   :  { %v622_v57 = vsub.s32 %v619_v50, %v3592_v52 }
  0xd1   :  { %v606_v15 = vpop.xlane.xlu0 %605 }
  0xd2   :  { %2278 = vrsqrt.f32 %v606_v15  ;;  %vm609_vm1 = vcmp.eq.f32.partialorder %v606_v15, inf  ;;  %v612_v47 = vand.u32 2147483648, %v606_v15  ;;  %vm611_vm2 = vcmp.eq.f32.partialorder %v606_v15, 0.0 }
  0xdf   :  { %v2279_v56 = vpop.eup %2278 }
  0xe0   :  { %v608_v63 = vmul.f32 %v2279_v56, %v606_v15 }
  0xe2   :  { %v610_v58 = vsel %vm609_vm1, %v606_v15, %v608_v63  ;;  %v3596_v63 = vld [vmem:[#allocation91_spill] sm:$0xff] }
  0xe3   :  { %v613_v45 = vsel %vm611_vm2, %v612_v47, %v610_v58  ;;  %v3601_v47 = vld [vmem:[#allocation55_spill] sm:$0xff] }
  0xe4   :  { %v614_v37 = vadd.f32 1e-08, %v613_v45 }
  0xe6   :  { %2280 = vrcp.f32 %v614_v37 }
  0xf3   :  { %v2281_v49 = vpop.eup %2280 }
  0xf4   :  { %v623_v13 = vrot.slane %v2281_v49, %v622_v57 }
  0xf6   :  { %v625_v59 = vmul.f32 %v623_v13, %v3593_v24  ;;  %v626_v46 = vmul.f32 %v623_v13, %v3594_v55  ;;  %v3602_v13 = vld [vmem:[#allocation56_spill] sm:$0xff]  ;;  %v3603_v55 = vld [vmem:[#allocation57_spill] sm:$0xff]  ;;  %v3604_v24 = vld [vmem:[#allocation58_spill] sm:$0xff] }
  0xf8   :  { %v627_v43 = vmul.f32 10.0, %v625_v59  ;;  %v628_v56 = vmul.f32 10.0, %v626_v46  ;;  %v3599_v46 = vld [vmem:[#allocation53_spill] sm:$0xff] }
  0xfa   :  { %v629_v39 = vadd.f32 %v627_v43, %v3595_v44  ;;  %v630_v15 = vadd.f32 %v628_v56, %v3596_v63  ;;  %v3597_v44 = vld [vmem:[#allocation50_spill] sm:$0xff]  ;;  %v3605_v56 = vld [vmem:[#allocation59_spill] sm:$0xff]  ;;  %v3606_v63 = vld [vmem:[#allocation60_spill] sm:$0xff] }
  0xfc   :  { %v640_v45 = vrot.slane %v629_v39, %v2632_v35  ;;  %v633_v37 = vcombine.high %v629_v39, %v629_v39  ;;  %v650_v58 = vcombine.high %v630_v15, %v630_v15  ;;  %v3042_v38 = vrot.slane %v630_v15, %v2632_v35  ;;  %v3598_v39 = vld [vmem:[#allocation51_spill] sm:$0xff]  ;;  %v3607_v15 = vld [vmem:[#allocation61_spill] sm:$0xff] }
  0xfe   :  { %v648_v50 = vcombine.high %v640_v45, %v640_v45  ;;  %v647_v49 = vrot.slane %v633_v37, %v2632_v35  ;;  %v3046_v57 = vrot.slane %v650_v58, %v2632_v35  ;;  %v665_v43 = vcombine.high %v3042_v38, %v3042_v38  ;;  %v3609_v37 = vld [vmem:[#allocation63_spill] sm:$0xff]  ;;  %v3610_v58 = vld [vmem:[#allocation64_spill] sm:$0xff]  ;;  %v3616_v35 = vld [vmem:[#allocation70_spill] sm:$0xff] }
 0x100   :  { %739 = vmatprep.mubr.f32.mxu0 %v648_v50  ;;  %v649_v52 = vcombine.high %v647_v49, %v647_v49  ;;  %v666_v59 = vcombine.high %v3046_v57, %v3046_v57  ;;  %v3611_v50 = vld [vmem:[#allocation65_spill] sm:$0xff] }
 0x101   :  { %740 = vmatmul.mubr.f32.vlgmr.msra.gmra.mxu0 %v640_v45  ;;  %v3608_v45 = vld [vmem:[#allocation62_spill] sm:$0xff] }
 0x102   :  { %1919 = vmatpush3.msra.mxu0 %v3597_v44  ;;  %809 = vmatprep.mubr.f32.mxu1 %v649_v52  ;;  %v3613_v52 = vld [vmem:[#allocation67_spill] sm:$0xff] }
 0x103   :  { %1920 = vmatprep.subr.mxu0 %v3598_v39  ;;  %879 = vmatprep.mubr.f32.mxu0 %v665_v43  ;;  %v3614_v43 = vld [vmem:[#allocation68_spill] sm:$0xff] }
 0x104   :  { %810 = vmatmul.mubr.f32.vlgmr.msra.gmra.mxu1 %v647_v49  ;;  %1921 = vmatpush3.msra.mxu0 %v3599_v46  ;;  %v3612_v49 = vld [vmem:[#allocation66_spill] sm:$0xff] }
 0x105   :  { %1954 = vmatpush3.msra.mxu1 %v3600_v53  ;;  %1922 = vmatprep.subr.mxu0 %v3601_v47 }
 0x106   :  { %1955 = vmatprep.subr.mxu1 %v3602_v13  ;;  %949 = vmatprep.mubr.f32.mxu1 %v666_v59  ;;  %v3615_v59 = vld [vmem:[#allocation69_spill] sm:$0xff] }
 0x107   :  { %1923 = vmatpush3.msra.mxu0 %v3603_v55  ;;  %1956 = vmatpush3.msra.mxu1 %v3604_v24 }
 0x108   :  { %1924 = vmatprep.subr.mxu0 %v3605_v56  ;;  %1957 = vmatprep.subr.mxu1 %v3606_v63  ;;  %v3617_v56 = vld [vmem:[#allocation71_spill] sm:$0xff] }
 0x109   :  { %1925 = vmatpush3.msra.mxu0 %v3607_v15  ;;  %1958 = vmatpush3.msra.mxu1 %v3608_v45  ;;  %v3618_v15 = vld [vmem:[#allocation72_spill] sm:$0xff]  ;;  %v3619_v45 = vld [vmem:[#allocation73_spill] sm:$0xff] }
 0x10a   :  { %1926 = vmatprep.subr.mxu0 %v3609_v37  ;;  %1959 = vmatprep.subr.mxu1 %v3610_v58  ;;  %v3620_v37 = vld [vmem:[#allocation74_spill] sm:$0xff]  ;;  %v3621_v58 = vld [vmem:[#allocation75_spill] sm:$0xff] }
 0x10b   :  { %1927 = vmatpush3.msra.mxu0 %v3611_v50  ;;  %1960 = vmatpush3.msra.mxu1 %v3612_v49  ;;  %v3622_v50 = vld [vmem:[#allocation76_spill] sm:$0xff]  ;;  %v3623_v49 = vld [vmem:[#allocation77_spill] sm:$0xff] }
 0x10c   :  { %1928 = vmatprep.subr.mxu0 %v3613_v52  ;;  %1961 = vmatprep.subr.mxu1 %v3614_v43  ;;  %v3624_v52 = vld [vmem:[#allocation78_spill] sm:$0xff]  ;;  %v3625_v43 = vld [vmem:[#allocation79_spill] sm:$0xff] }
 0x10d   :  { %1929 = vmatpush3.msra.mxu0 %v3615_v59  ;;  %1962 = vmatpush3.msra.mxu1 %v3616_v35  ;;  %v3626_v59 = vld [vmem:[#allocation80_spill] sm:$0xff]  ;;  %v3627_v35 = vld [vmem:[#allocation81_spill] sm:$0xff] }
 0x10e   :  { %1930 = vmatprep.subr.mxu0 %v3617_v56  ;;  %1963 = vmatprep.subr.mxu1 %v3618_v15  ;;  %v3628_v56 = vld [vmem:[#allocation82_spill] sm:$0xff]  ;;  %v3629_v15 = vld [vmem:[#allocation83_spill] sm:$0xff] }
 0x10f   :  { %1931 = vmatpush3.msra.mxu0 %v3619_v45  ;;  %1964 = vmatpush3.msra.mxu1 %v3620_v37  ;;  %v3630_v45 = vld [vmem:[#allocation84_spill] sm:$0xff]  ;;  %v3631_v37 = vld [vmem:[#allocation85_spill] sm:$0xff] }
 0x110   :  { %1932 = vmatprep.subr.mxu0 %v3621_v58  ;;  %1965 = vmatprep.subr.mxu1 %v3622_v50  ;;  %v3632_v58 = vld [vmem:[#allocation86_spill] sm:$0xff]  ;;  %v3633_v50 = vld [vmem:[#allocation87_spill] sm:$0xff] }
 0x111   :  { %1933 = vmatpush3.msra.mxu0 %v3623_v49  ;;  %1966 = vmatpush3.msra.mxu1 %v3624_v52  ;;  %v3634_v49 = vld [vmem:[#allocation88_spill] sm:$0xff]  ;;  %v3635_v52 = vld [vmem:[#allocation89_spill] sm:$0xff] }
 0x112   :  { %1934 = vmatprep.subr.mxu0 %v3625_v43  ;;  %1967 = vmatprep.subr.mxu1 %v3626_v59  ;;  %v3636_v43 = vld [vmem:[#allocation90_spill] sm:$0xff]  ;;  %v3637_v59 = vld [vmem:[#allocation92_spill] sm:$0xff] }
 0x113   :  { %1935 = vmatpush3.msra.mxu0 %v3627_v35  ;;  %1968 = vmatpush3.msra.mxu1 %v3628_v56  ;;  %v3638_v35 = vld [vmem:[#allocation93_spill] sm:$0xff]  ;;  %v3639_v56 = vld [vmem:[#allocation94_spill] sm:$0xff] }
 0x114   :  { %1936 = vmatprep.subr.mxu0 %v3629_v15  ;;  %1969 = vmatprep.subr.mxu1 %v3630_v45  ;;  %v3640_v15 = vld [vmem:[#allocation95_spill] sm:$0xff]  ;;  %v3641_v45 = vld [vmem:[#allocation96_spill] sm:$0xff] }
 0x115   :  { %1937 = vmatpush3.msra.mxu0 %v3631_v37  ;;  %1970 = vmatpush3.msra.mxu1 %v3632_v58  ;;  %v3642_v37 = vld [vmem:[#allocation97_spill] sm:$0xff]  ;;  %v1740_v58 = vpop.f32.mrf.mxu0 }
 0x116   :  { %1938 = vmatprep.subr.mxu0 %v3633_v50  ;;  %1971 = vmatprep.subr.mxu1 %v3634_v49  ;;  %v3643_v50 = vld [vmem:[#allocation98_spill] sm:$0xff]  ;;  %v3644_v49 = vld [vmem:[#allocation99_spill] sm:$0xff] }
 0x117   :  { %1939 = vmatpush3.msra.mxu0 %v3635_v52  ;;  %1972 = vmatpush3.msra.mxu1 %v3636_v43  ;;  %v3645_v52 = vld [vmem:[#allocation100_spill] sm:$0xff] }
 0x118   :  { %1940 = vmatprep.subr.mxu0 %v3637_v59  ;;  %1973 = vmatprep.subr.mxu1 %v3638_v35  ;;  %v3646_v59 = vld [vmem:[#allocation101_spill] sm:$0xff]  ;;  %v3647_v35 = vld [vmem:[#allocation102_spill] sm:$0xff] }
 0x119   :  { %1941 = vmatpush3.msra.mxu0 %v3639_v56  ;;  %1974 = vmatpush3.msra.mxu1 %v3640_v15  ;;  %v3648_v56 = vld [vmem:[#allocation103_spill] sm:$0xff]  ;;  %v1775_v15 = vpop.f32.mrf.mxu1 }
 0x11a   :  { %1942 = vmatprep.subr.mxu0 %v3641_v45  ;;  %1975 = vmatprep.subr.mxu1 %v3642_v37  ;;  %v1741_v45 = vpop.f32.mrf.mxu0 }
 0x11b   :  { %1943 = vmatpush3.msra.mxu0 %v3643_v50  ;;  %1976 = vmatpush3.msra.mxu1 %v3644_v49 }
 0x11c   :  { %1944 = vmatprep.subr.mxu0 %v2920_v62  ;;  %1977 = vmatprep.subr.mxu1 %v3645_v52 }
 0x11d   :  { %1945 = vmatpush3.msra.mxu0 %v3646_v59  ;;  %1978 = vmatpush3.msra.mxu1 %v3647_v35  ;;  %v1742_v59 = vadd.f32 %v1741_v45, %v1740_v58 }
 0x11e   :  { %1946 = vmatprep.subr.mxu0 %v3648_v56  ;;  %1979 = vmatprep.subr.mxu1 %v2936_v41  ;;  %v3117_v56 = vld [vmem:[%s3314_s2] ss:$0 sm:$0xff] }
 0x11f   :  { %1947 = vmatpush3.msra.mxu0 %v2941_v54  ;;  %1980 = vmatpush3.msra.mxu1 %v2943_v25  ;;  %v1776_v54 = vpop.f32.mrf.mxu1  ;;  %v303_v45 = vadd.f32 %v1742_v59, %v3117_v56  ;;  %v3677_v59 = vld [vmem:[#allocation44_spill] sm:$0xff] }
 0x120   :  { %1948 = vmatprep.subr.mxu0 %v2947_v60  ;;  %1981 = vmatprep.subr.mxu1 %v2949_v61  ;;  %v1777_v58 = vadd.f32 %v1776_v54, %v1775_v15  ;;  %v3676_v15 = vld [vmem:[#allocation45_spill] sm:$0xff] }
 0x121   :  { %1949 = vmatpush3.msra.mxu0 %v2953_v51  ;;  %1982 = vmatpush3.msra.mxu1 %v2957_v42 }
 0x122   :  { %880 = vmatmul.mubr.f32.vlgmr.msra.gmra.mxu0 %v3042_v38  ;;  %1983 = vmatprep.subr.mxu1 %v2961_v48  ;;  %v373_v51 = vadd.f32 %v1777_v58, %v303_v45  ;;  %v3678_v45 = vld [vmem:[#allocation47_spill] sm:$0xff]  ;;  %v3679_v58 = vld [vmem:[#allocation46_spill] sm:$0xff] }
 0x123   :  { %1984 = vmatpush3.msra.mxu1 %v2964_v14  ;;  %1988 = vmatprep.subr.mxu0 %v2546_v0 }
 0x124   :  { %950 = vmatmul.mubr.f32.vlgmr.msra.gmra.mxu1 %v3046_v57  ;;  %2022 = vmatprep.subr.mxu1 %v2553_v3 }
 0x125   :  { %1989 = vmatpush3.xpose.msra.mxu0 %v2548_v1  ;;  %2023 = vmatpush3.xpose.msra.mxu1 %v2557_v5 }
 0x126   :  { %1990 = vmatprep.subr.mxu0 %v2550_v2  ;;  %2024 = vmatprep.subr.mxu1 %v2563_v7  ;;  %v3650_v7 = vld [vmem:[#allocation18_spill] sm:$0xff] }
 0x129   :  { %v1810_v38 = vpop.f32.mrf.mxu0  ;;  %1991 = vmatpush3.xpose.msra.mxu0 %v2555_v4  ;;  %2025 = vmatpush3.xpose.msra.mxu1 %v2569_v9  ;;  %v3652_v9 = vld [vmem:[#allocation20_spill] sm:$0xff] }
 0x12a   :  { %1992 = vmatprep.subr.mxu0 %v2561_v6  ;;  %2026 = vmatprep.subr.mxu1 %v2571_v10  ;;  %v3649_v6 = vld [vmem:[#allocation16_spill] sm:$0xff]  ;;  %v3653_v10 = vld [vmem:[#allocation19_spill] sm:$0xff] }
 0x12b   :  { %v1811_v0 = vpop.f32.mrf.mxu0  ;;  %v1845_v54 = vpop.f32.mrf.mxu1 }
 0x12c   :  { %v1812_v3 = vadd.f32 %v1811_v0, %v1810_v38  ;;  %v3680_v38 = vld [vmem:[#allocation49_spill] sm:$0xff]  ;;  %v3681_v0 = vld [vmem:[#allocation48_spill] sm:$0xff] }
 0x12d   :  { %v1846_v57 = vpop.f32.mrf.mxu1  ;;  %1993 = vmatpush3.xpose.msra.mxu0 %v2567_v8  ;;  %2027 = vmatpush3.xpose.msra.mxu1 %v2577_v12  ;;  %v3651_v8 = vld [vmem:[#allocation17_spill] sm:$0xff] }
 0x12e   :  { %v443_v1 = vadd.f32 %v1812_v3, %v373_v51  ;;  %v1847_v2 = vadd.f32 %v1846_v57, %v1845_v54  ;;  %1994 = vmatprep.subr.mxu0 %v2575_v11  ;;  %2028 = vmatprep.subr.mxu1 %v2583_v17  ;;  %v3654_v11 = vld [vmem:[#allocation22_spill] sm:$0xff]  ;;  %v3655_v12 = vld [vmem:[#allocation21_spill] sm:$0xff]  ;;  %v3657_v17 = vld [vmem:[#allocation23_spill] sm:$0xff] }
 0x12f   :  { %v3675_v51 = vld [vmem:[#allocation42_spill] sm:$0xff]  ;;  %v3682_v3 = vld [vmem:[#allocation52_spill] sm:$0xff] }
 0x130   :  { %v513_v4 = vadd.f32 %v1847_v2, %v443_v1 }
 0x131   :  { %1995 = vmatpush3.xpose.msra.mxu0 %v2581_v16  ;;  %2029 = vmatpush3.xpose.msra.mxu1 %v2589_v19  ;;  %v3656_v16 = vld [vmem:[#allocation24_spill] sm:$0xff]  ;;  %v3659_v19 = vld [vmem:[#allocation25_spill] sm:$0xff] }
 0x132   :  { %v517_v5 = vsel %vm516_vm0, %v513_v4, -inf  ;;  %1996 = vmatprep.subr.mxu0 %v2587_v18  ;;  %2030 = vmatprep.subr.mxu1 %v2595_v21  ;;  %v3658_v18 = vld [vmem:[#allocation26_spill] sm:$0xff]  ;;  %v3661_v21 = vld [vmem:[#allocation27_spill] sm:$0xff] }
 0x133   :  { %518 = vmax.xlane.f32.xlu0 %v517_v5 }
 0x135   :  { %1997 = vmatpush3.xpose.msra.mxu0 %v2593_v20  ;;  %2031 = vmatpush3.xpose.msra.mxu1 %v2601_v23  ;;  %v3660_v20 = vld [vmem:[#allocation28_spill] sm:$0xff]  ;;  %v3663_v23 = vld [vmem:[#allocation29_spill] sm:$0xff] }
 0x136   :  { %1998 = vmatprep.subr.mxu0 %v2599_v22  ;;  %2032 = vmatprep.subr.mxu1 %v2609_v27  ;;  %v3662_v22 = vld [vmem:[#allocation30_spill] sm:$0xff]  ;;  %v3665_v27 = vld [vmem:[#allocation32_spill] sm:$0xff] }
 0x139   :  { %1999 = vmatpush3.xpose.msra.mxu0 %v2607_v26  ;;  %2033 = vmatpush3.xpose.msra.mxu1 %v2615_v29  ;;  %v3664_v26 = vld [vmem:[#allocation33_spill] sm:$0xff]  ;;  %v3667_v29 = vld [vmem:[#allocation34_spill] sm:$0xff] }
 0x13a   :  { %2000 = vmatprep.subr.mxu0 %v2613_v28  ;;  %2034 = vmatprep.subr.mxu1 %v2621_v31  ;;  %v3666_v28 = vld [vmem:[#allocation35_spill] sm:$0xff]  ;;  %v3669_v31 = vld [vmem:[#allocation36_spill] sm:$0xff] }
 0x13d   :  { %2001 = vmatpush3.xpose.msra.mxu0 %v2619_v30  ;;  %2035 = vmatpush3.xpose.msra.mxu1 %v2629_v34  ;;  %v3668_v30 = vld [vmem:[#allocation37_spill] sm:$0xff] }
 0x13e   :  { %2002 = vmatprep.subr.mxu0 %v2625_v32  ;;  %2036 = vmatprep.subr.mxu1 %v2636_v36  ;;  %v3670_v32 = vld [vmem:[#allocation39_spill] sm:$0xff]  ;;  %v3672_v34 = vld [vmem:[#allocation41_spill] sm:$0xff]  ;;  %v3673_v36 = vld [vmem:[#allocation40_spill] sm:$0xff] }
 0x141   :  { %2003 = vmatpush3.xpose.msra.mxu0 %v2627_v33  ;;  %2037 = vmatpush3.xpose.msra.mxu1 %v2646_v40  ;;  %v3671_v33 = vld [vmem:[#allocation38_spill] sm:$0xff]  ;;  %v3674_v40 = vld [vmem:[#allocation43_spill] sm:$0xff] }
 0x142   :  { %2004 = vmatprep.subr.mxu0 %v3649_v6  ;;  %2038 = vmatprep.subr.mxu1 %v3650_v7 }
 0x145   :  { %2005 = vmatpush3.xpose.msra.mxu0 %v3651_v8  ;;  %2039 = vmatpush3.xpose.msra.mxu1 %v3652_v9 }
 0x146   :  { %2006 = vmatprep.subr.mxu0 %v3653_v10  ;;  %2040 = vmatprep.subr.mxu1 %v3654_v11 }
 0x149   :  { %2007 = vmatpush3.xpose.msra.mxu0 %v3655_v12  ;;  %2041 = vmatpush3.xpose.msra.mxu1 %v3656_v16 }
 0x14a   :  { %2008 = vmatprep.subr.mxu0 %v3657_v17  ;;  %2042 = vmatprep.subr.mxu1 %v3658_v18 }
 0x14d   :  { %2009 = vmatpush3.xpose.msra.mxu0 %v3659_v19  ;;  %2043 = vmatpush3.xpose.msra.mxu1 %v3660_v20 }
 0x14e   :  { %2010 = vmatprep.subr.mxu0 %v3661_v21  ;;  %2044 = vmatprep.subr.mxu1 %v3662_v22 }
 0x151   :  { %2011 = vmatpush3.xpose.msra.mxu0 %v3663_v23  ;;  %2045 = vmatpush3.xpose.msra.mxu1 %v3664_v26 }
 0x152   :  { %2012 = vmatprep.subr.mxu0 %v3665_v27  ;;  %2046 = vmatprep.subr.mxu1 %v3666_v28 }
 0x155   :  { %2013 = vmatpush3.xpose.msra.mxu0 %v3667_v29  ;;  %2047 = vmatpush3.xpose.msra.mxu1 %v3668_v30 }
 0x156   :  { %2014 = vmatprep.subr.mxu0 %v3669_v31  ;;  %2048 = vmatprep.subr.mxu1 %v3670_v32 }
 0x159   :  { %2015 = vmatpush3.xpose.msra.mxu0 %v3671_v33  ;;  %2049 = vmatpush3.xpose.msra.mxu1 %v3672_v34 }
 0x15a   :  { %2016 = vmatprep.subr.mxu0 %v3673_v36  ;;  %2050 = vmatprep.subr.mxu1 %v3674_v40 }
 0x15d   :  { %2017 = vmatpush3.xpose.msra.mxu0 %v3675_v51  ;;  %2051 = vmatpush3.xpose.msra.mxu1 %v3676_v15 }
 0x15e   :  { %2018 = vmatprep.subr.mxu0 %v3677_v59  ;;  %2052 = vmatprep.subr.mxu1 %v3678_v45  ;;  %v3685_v59 = vld [vmem:[#allocation64_spill] sm:$0xff]  ;;  %v3686_v45 = vld [vmem:[#allocation61_spill] sm:$0xff] }
 0x161   :  { %2019 = vmatpush3.xpose.msra.mxu0 %v3679_v58  ;;  %2053 = vmatpush3.xpose.msra.mxu1 %v3680_v38  ;;  %v3694_v58 = vld [vmem:[#allocation69_spill] sm:$0xff]  ;;  %v3695_v38 = vld [vmem:[#allocation74_spill] sm:$0xff] }
 0x162   :  { %2056 = vmatprep.subr.mxu0 %v3681_v0  ;;  %2090 = vmatprep.subr.mxu1 %v3682_v3  ;;  %v3696_v0 = vld [vmem:[#allocation71_spill] sm:$0xff]  ;;  %v3697_v3 = vld [vmem:[#allocation76_spill] sm:$0xff] }
 0x1bc   :  { %v519_v54 = vpop.xlane.xlu0 %518 }
 0x1bd   :  { %v3189_v57 = vsub.f32 %v513_v4, %v519_v54  ;;  %v3698_v54 = vld [vmem:[#allocation73_spill] sm:$0xff] }
 0x1bf   :  { %v521_v6 = vmul.f32 1.442695, %v3189_v57 }
 0x1c1   :  { %v1880_v1 = vpop.f32.mrf.mxu0  ;;  %2282 = vpow2.f32 %v521_v6  ;;  %v3702_v6 = vld [vmem:[#allocation77_spill] sm:$0xff] }
 0x1c3   :  { %v1881_v2 = vpop.f32.mrf.mxu0 }
 0x1c4   :  { %v1915_v5 = vpop.f32.mrf.mxu1  ;;  %v1882_v7 = vadd.f32 %v1881_v2, %v1880_v1  ;;  %v3699_v1 = vld [vmem:[#allocation78_spill] sm:$0xff]  ;;  %v3700_v2 = vld [vmem:[#allocation75_spill] sm:$0xff] }
 0x1c6   :  { %v1916_v8 = vpop.f32.mrf.mxu1  ;;  %v742_v9 = vadd.f32 %v1882_v7, %v3117_v56  ;;  %v3703_v7 = vld [vmem:[#allocation82_spill] sm:$0xff] }
 0x1c7   :  { %v1917_v10 = vadd.f32 %v1916_v8, %v1915_v5  ;;  %v3701_v5 = vld [vmem:[#allocation80_spill] sm:$0xff]  ;;  %v3704_v8 = vld [vmem:[#allocation79_spill] sm:$0xff] }
 0x1c9   :  { %v812_v17 = vadd.f32 %v1917_v10, %v742_v9  ;;  %v3705_v9 = vld [vmem:[#allocation84_spill] sm:$0xff]  ;;  %v3706_v10 = vld [vmem:[#allocation81_spill] sm:$0xff] }
 0x1ce   :  { %v2283_v23 = vpop.eup %2282 }
 0x1cf   :  { %v523_v26 = vsel %vm516_vm0, %v2283_v23, 0.0 }
 0x1e2   :  { %v1950_v11 = vpop.f32.mrf.mxu0 }
 0x1e4   :  { %v1951_v12 = vpop.f32.mrf.mxu0  ;;  %v1985_v16 = vpop.f32.mrf.mxu1 }
 0x1e5   :  { %v1952_v18 = vadd.f32 %v1951_v12, %v1950_v11  ;;  %v3707_v11 = vld [vmem:[#allocation86_spill] sm:$0xff]  ;;  %v3708_v12 = vld [vmem:[#allocation83_spill] sm:$0xff] }
 0x1e6   :  { %v1986_v19 = vpop.f32.mrf.mxu1 }
 0x1e7   :  { %v882_v20 = vadd.f32 %v1952_v18, %v812_v17  ;;  %v1987_v21 = vadd.f32 %v1986_v19, %v1985_v16  ;;  %v3709_v16 = vld [vmem:[#allocation88_spill] sm:$0xff]  ;;  %v3710_v17 = vld [vmem:[#allocation85_spill] sm:$0xff]  ;;  %v3711_v18 = vld [vmem:[#allocation87_spill] sm:$0xff] }
 0x1e8   :  { %v3712_v19 = vld [vmem:[#allocation93_spill] sm:$0xff] }
 0x1e9   :  { %v952_v4 = vadd.f32 %v1987_v21, %v882_v20  ;;  %v3713_v20 = vld [vmem:[#allocation89_spill] sm:$0xff]  ;;  %v3714_v21 = vld [vmem:[#allocation95_spill] sm:$0xff] }
 0x1eb   :  { %v955_v22 = vsel %vm516_vm0, %v952_v4, -inf }
 0x1ec   :  { %956 = vmax.xlane.f32.xlu1 %v955_v22  ;;  %v3716_v22 = vld [vmem:[#allocation94_spill] sm:$0xff] }
 0x1f0   :  { %524 = vadd.xlane.f32.xlu1 %v523_v26  ;;  %v2310_v26 = vld [vmem:[#allocation5 + $0x68] sm:$0xff] }
 0x275   :  { %v957_v27 = vpop.xlane.xlu1 %956 }
 0x276   :  { %v958_v28 = vsub.f32 %v952_v4, %v957_v27  ;;  %v3715_v4 = vld [vmem:[#allocation92_spill] sm:$0xff]  ;;  %v2311_v27 = vld [vmem:[#allocation5 + $0x168] sm:$0xff] }
 0x278   :  { %v959_v29 = vmul.f32 1.442695, %v958_v28  ;;  %v2312_v28 = vld [vmem:[#allocation5 + $0xe0] sm:$0xff] }
 0x279   :  { %v3196_v32 = vpop.xlane.xlu1 %524 }
 0x27a   :  { %2284 = vpow2.f32 %v959_v29  ;;  %v2313_v29 = vld [vmem:[#allocation5 + $0x1e0] sm:$0xff] }
 0x27b   :  { %2286 = vrcp.f32 %v3196_v32 }
 0x287   :  { %v2285_v30 = vpop.eup %2284 }
 0x288   :  { %v961_v31 = vsel %vm516_vm0, %v2285_v30, 0.0  ;;  %v2287_v34 = vpop.eup %2286 }
 0x289   :  { %962 = vadd.xlane.f32.xlu0 %v961_v31  ;;  %v3199_v40 = vmul.f32 %v2287_v34, %v2283_v23  ;;  %v3717_v23 = vld [vmem:[#allocation96_spill] sm:$0xff]  ;;  %v2315_v31 = vld [vmem:[#allocation5 + $0x160] sm:$0xff]  ;;  %v2317_v34 = vld [vmem:[#allocation5 + $0x1d8] sm:$0xff] }
 0x312   :  { %v963_v33 = vpop.xlane.xlu0 %962 }
 0x313   :  { %2288 = vrcp.f32 %v963_v33  ;;  %v2316_v33 = vld [vmem:[#allocation5 + $0xd8] sm:$0xff] }
 0x320   :  { %v2289_v36 = vpop.eup %2288 }
 0x321   :  { %v965_v51 = vmul.f32 %v2289_v36, %v2285_v30  ;;  %v2314_v30 = vld [vmem:[#allocation5 + $0x60] sm:$0xff]  ;;  %v2318_v36 = vld [vmem:[#allocation5 + $0x58] sm:$0xff] }
 0x323   :  { %v3202_v15 = vsub.f32 %v965_v51, %v3199_v40  ;;  %v2319_v51 = vld [vmem:[#allocation5 + $0x158] sm:$0xff] }
 0x325   :  { %2020 = vmatprep.mubr.f32.mxu0 %v3202_v15  ;;  %2054 = vmatprep.mubr.f32.mxu1 %v3202_v15 }
 0x326   :  { %2021 = vmatmul.mubr.f32.vlgmr.msra.gmra.mxu0 %v3202_v15  ;;  %2055 = vmatmul.mubr.f32.vlgmr.msra.gmra.mxu1 %v3202_v15 }
 0x327   :  { %2057 = vmatpush3.xpose.msra.mxu0 %v3597_v44  ;;  %2091 = vmatpush3.xpose.msra.mxu1 %v3600_v53  ;;  %v3683_v44 = vld [vmem:[#allocation62_spill] sm:$0xff]  ;;  %v3684_v53 = vld [vmem:[#allocation59_spill] sm:$0xff] }
 0x328   :  { %2088 = vmatprep.mubr.f32.mxu0 %v3202_v15  ;;  %2122 = vmatprep.mubr.f32.mxu1 %v3202_v15 }
 0x329   :  { %2058 = vmatprep.subr.mxu0 %v3598_v39  ;;  %2092 = vmatprep.subr.mxu1 %v3602_v13  ;;  %v3687_v39 = vld [vmem:[#allocation66_spill] sm:$0xff]  ;;  %v3688_v13 = vld [vmem:[#allocation63_spill] sm:$0xff] }
 0x32b   :  { %2059 = vmatpush3.xpose.msra.mxu0 %v3599_v46  ;;  %2093 = vmatpush3.xpose.msra.mxu1 %v3604_v24  ;;  %v3689_v46 = vld [vmem:[#allocation68_spill] sm:$0xff]  ;;  %v3690_v24 = vld [vmem:[#allocation65_spill] sm:$0xff] }
 0x32c   :  { %2060 = vmatprep.subr.mxu0 %v3601_v47  ;;  %2094 = vmatprep.subr.mxu1 %v3606_v63  ;;  %v3691_v47 = vld [vmem:[#allocation70_spill] sm:$0xff]  ;;  %v3692_v63 = vld [vmem:[#allocation67_spill] sm:$0xff] }
 0x32f   :  { %2061 = vmatpush3.xpose.msra.mxu0 %v3603_v55  ;;  %2095 = vmatpush3.xpose.msra.mxu1 %v3683_v44  ;;  %v3693_v55 = vld [vmem:[#allocation72_spill] sm:$0xff] }
 0x330   :  { %2062 = vmatprep.subr.mxu0 %v3684_v53  ;;  %2096 = vmatprep.subr.mxu1 %v3685_v59  ;;  %v2321_v44 = vld [vmem:[#allocation5 + $0x1d0] sm:$0xff] }
 0x331   :  { %v2322_v53 = vld [vmem:[#allocation5 + $0x50] sm:$0xff] }
 0x332   :  { %v2323_v59 = vld [vmem:[#allocation5 + $0x150] sm:$0xff] }
 0x333   :  { %2063 = vmatpush3.xpose.msra.mxu0 %v3686_v45  ;;  %2097 = vmatpush3.xpose.msra.mxu1 %v3687_v39  ;;  %v2324_v45 = vld [vmem:[#allocation5 + $0xc8] sm:$0xff] }
 0x334   :  { %2064 = vmatprep.subr.mxu0 %v3688_v13  ;;  %2098 = vmatprep.subr.mxu1 %v3689_v46  ;;  %v2325_v39 = vld [vmem:[#allocation5 + $0x1c8] sm:$0xff] }
 0x335   :  { %v2326_v13 = vld [vmem:[#allocation5 + $0x48] sm:$0xff] }
 0x336   :  { %v2327_v46 = vld [vmem:[#allocation5 + $0x148] sm:$0xff] }
 0x337   :  { %2065 = vmatpush3.xpose.msra.mxu0 %v3690_v24  ;;  %2099 = vmatpush3.xpose.msra.mxu1 %v3691_v47  ;;  %v2328_v24 = vld [vmem:[#allocation5 + $0xc0] sm:$0xff] }
 0x338   :  { %2066 = vmatprep.subr.mxu0 %v3692_v63  ;;  %2100 = vmatprep.subr.mxu1 %v3693_v55  ;;  %v2329_v47 = vld [vmem:[#allocation5 + $0x1c0] sm:$0xff] }
 0x339   :  { %v2330_v63 = vld [vmem:[#allocation5 + $0x40] sm:$0xff] }
 0x33a   :  { %v2331_v55 = vld [vmem:[#allocation5 + $0x140] sm:$0xff] }
 0x33b   :  { %2067 = vmatpush3.xpose.msra.mxu0 %v3694_v58  ;;  %2101 = vmatpush3.xpose.msra.mxu1 %v3695_v38  ;;  %v2332_v58 = vld [vmem:[#allocation5 + $0xb8] sm:$0xff] }
 0x33c   :  { %2068 = vmatprep.subr.mxu0 %v3696_v0  ;;  %2102 = vmatprep.subr.mxu1 %v3697_v3  ;;  %v2333_v38 = vld [vmem:[#allocation5 + $0x1b8] sm:$0xff] }
 0x33d   :  { %v2334_v0 = vld [vmem:[#allocation5 + $0x38] sm:$0xff] }
 0x33e   :  { %v2335_v3 = vld [vmem:[#allocation5 + $0x138] sm:$0xff] }
 0x33f   :  { %2069 = vmatpush3.xpose.msra.mxu0 %v3698_v54  ;;  %2103 = vmatpush3.xpose.msra.mxu1 %v3699_v1  ;;  %v2336_v54 = vld [vmem:[#allocation5 + $0xb0] sm:$0xff] }
 0x340   :  { %2070 = vmatprep.subr.mxu0 %v3700_v2  ;;  %2104 = vmatprep.subr.mxu1 %v3701_v5  ;;  %v2337_v1 = vld [vmem:[#allocation5 + $0x1b0] sm:$0xff] }
 0x341   :  { %v2338_v2 = vld [vmem:[#allocation5 + $0x30] sm:$0xff] }
 0x342   :  { %v2339_v5 = vld [vmem:[#allocation5 + $0x130] sm:$0xff] }
 0x343   :  { %2071 = vmatpush3.xpose.msra.mxu0 %v3702_v6  ;;  %2105 = vmatpush3.xpose.msra.mxu1 %v3703_v7  ;;  %v2340_v6 = vld [vmem:[#allocation5 + $0xa8] sm:$0xff] }
 0x344   :  { %2072 = vmatprep.subr.mxu0 %v3704_v8  ;;  %2106 = vmatprep.subr.mxu1 %v3705_v9  ;;  %v2341_v7 = vld [vmem:[#allocation5 + $0x1a8] sm:$0xff] }
 0x345   :  { %v2342_v8 = vld [vmem:[#allocation5 + $0x28] sm:$0xff] }
 0x346   :  { %v2343_v9 = vld [vmem:[#allocation5 + $0x128] sm:$0xff] }
 0x347   :  { %2073 = vmatpush3.xpose.msra.mxu0 %v3706_v10  ;;  %2107 = vmatpush3.xpose.msra.mxu1 %v3707_v11  ;;  %v2344_v10 = vld [vmem:[#allocation5 + $0xa0] sm:$0xff] }
 0x348   :  { %2074 = vmatprep.subr.mxu0 %v3708_v12  ;;  %2108 = vmatprep.subr.mxu1 %v3709_v16  ;;  %v2345_v11 = vld [vmem:[#allocation5 + $0x1a0] sm:$0xff] }
 0x349   :  { %v2346_v12 = vld [vmem:[#allocation5 + $0x20] sm:$0xff] }
 0x34a   :  { %v2347_v16 = vld [vmem:[#allocation5 + $0x120] sm:$0xff] }
 0x34b   :  { %2075 = vmatpush3.xpose.msra.mxu0 %v3710_v17  ;;  %2109 = vmatpush3.xpose.msra.mxu1 %v3636_v43  ;;  %v3718_v43 = vld [vmem:[#allocation101_spill] sm:$0xff] }
 0x34c   :  { %2076 = vmatprep.subr.mxu0 %v3711_v18  ;;  %2110 = vmatprep.subr.mxu1 %v3712_v19  ;;  %v2348_v17 = vld [vmem:[#allocation5 + $0x98] sm:$0xff] }
 0x34d   :  { %v2349_v18 = vld [vmem:[#allocation5 + $0x198] sm:$0xff] }
 0x34e   :  { %v2350_v19 = vld [vmem:[#allocation5 + $0x18] sm:$0xff] }
 0x34f   :  { %2077 = vmatpush3.xpose.msra.mxu0 %v3713_v20  ;;  %2111 = vmatpush3.xpose.msra.mxu1 %v3714_v21  ;;  %v2351_v20 = vld [vmem:[#allocation5 + $0x118] sm:$0xff]  ;;  %v2352_v21 = vld [vmem:[#allocation5 + $0x90] sm:$0xff] }
 0x350   :  { %2078 = vmatprep.subr.mxu0 %v3715_v4  ;;  %2112 = vmatprep.subr.mxu1 %v3642_v37  ;;  %v3719_v37 = vld [vmem:[#allocation103_spill] sm:$0xff]  ;;  %v2353_v4 = vld [vmem:[#allocation5 + $0x190] sm:$0xff] }
 0x353   :  { %2079 = vmatpush3.xpose.msra.mxu0 %v3716_v22  ;;  %2113 = vmatpush3.xpose.msra.mxu1 %v3644_v49  ;;  %v3720_v49 = vld [vmem:[#allocation104_spill] sm:$0xff] }
 0x354   :  { %2080 = vmatprep.subr.mxu0 %v3717_v23  ;;  %2114 = vmatprep.subr.mxu1 %v3645_v52  ;;  %v2309_v52 = vld [vmem:[#allocation5 + $0x1e8] sm:$0xff]  ;;  %v2354_v22 = vld [vmem:[#allocation5 + $0x10] sm:$0xff] }
 0x355   :  { %v2355_v23 = vld [vmem:[#allocation5 + $0x110] sm:$0xff] }
 0x357   :  { %2081 = vmatpush3.xpose.msra.mxu0 %v3643_v50  ;;  %2115 = vmatpush3.xpose.msra.mxu1 %v3647_v35  ;;  %v3721_v35 = vld [vmem:[#allocation105_spill] sm:$0xff]  ;;  %v2307_v50 = vld [vmem:[#allocation5 + $0x170] sm:$0xff] }
 0x358   :  { %2082 = vmatprep.subr.mxu0 %v2920_v62  ;;  %2116 = vmatprep.subr.mxu1 %v2936_v41  ;;  %v2300_v41 = vld [vmem:[#allocation5 + $0xf8] sm:$0xff] }
 0x359   :  { %v2301_v62 = vld [vmem:[#allocation5 + $0x1f8] sm:$0xff] }
 0x35b   :  { %2083 = vmatpush3.xpose.msra.mxu0 %v3718_v43  ;;  %2117 = vmatpush3.xpose.msra.mxu1 %v2943_v25  ;;  %v2303_v25 = vld [vmem:[#allocation5 + $0x178] sm:$0xff]  ;;  %v2356_v43 = vld [vmem:[#allocation5 + $0x88] sm:$0xff] }
 0x35c   :  { %2084 = vmatprep.subr.mxu0 %v3719_v37  ;;  %2118 = vmatprep.subr.mxu1 %v2949_v61  ;;  %v2302_v61 = vld [vmem:[#allocation5 + $0x78] sm:$0xff]  ;;  %v2357_v37 = vld [vmem:[#allocation5 + $0x188] sm:$0xff] }
 0x35f   :  { %2085 = vmatpush3.xpose.msra.mxu0 %v3720_v49  ;;  %2119 = vmatpush3.xpose.msra.mxu1 %v2957_v42  ;;  %v2304_v42 = vld [vmem:[#allocation5 + $0xf0] sm:$0xff]  ;;  %v2358_v49 = vld [vmem:[#allocation5 + $0x8] sm:$0xff] }
 0x360   :  { %2086 = vmatprep.subr.mxu0 %v2947_v60  ;;  %2120 = vmatprep.subr.mxu1 %v2961_v48  ;;  %v2305_v60 = vld [vmem:[#allocation5 + $0x1f0] sm:$0xff] }
 0x361   :  { %v2306_v48 = vld [vmem:[#allocation5 + $0x70] sm:$0xff] }
 0x363   :  { %2087 = vmatpush3.xpose.msra.mxu0 %v3721_v35  ;;  %2121 = vmatpush3.xpose.msra.mxu1 %v2964_v14  ;;  %v2308_v14 = vld [vmem:[#allocation5 + $0xe8] sm:$0xff] }
 0x364   :  { %2124 = vmatprep.subr.mxu0 %v2300_v41  ;;  %2159 = vmatprep.subr.mxu1 %v2301_v62  ;;  %v2359_v35 = vld [vmem:[#allocation5 + $0x108] sm:$0xff]  ;;  %v2360_v41 = vld [vmem:[#allocation5 + $0x80] sm:$0xff] }
 0x365   :  { %v2361_v62 = vld [vmem:[#allocation5 + $0x180] sm:$0xff] }
 0x366   :  { %2089 = vmatmul.mubr.f32.vlgmr.msra.gmra.mxu0 %v3202_v15  ;;  %2123 = vmatmul.mubr.f32.vlgmr.msra.gmra.mxu1 %v3202_v15  ;;  %v2320_v15 = vld [vmem:[#allocation5 + $0xd0] sm:$0xff] }
 0x367   :  { %2125 = vmatpush3.msra.mxu0 %v2302_v61  ;;  %2160 = vmatpush3.msra.mxu1 %v2303_v25  ;;  %v2362_v61 = vld [vmem:[#allocation5] sm:$0xff] }
 0x368   :  { %2126 = vmatprep.subr.mxu0 %v2304_v42  ;;  %2161 = vmatprep.subr.mxu1 %v2305_v60  ;;  %v2363_v25 = vld [vmem:[#allocation5 + $0x100] sm:$0xff]  ;;  %v2364_v42 = vld [vmem:[#allocation5 + $0x2f8] sm:$0xff] }
 0x369   :  { %2127 = vmatpush3.msra.mxu0 %v2306_v48  ;;  %2162 = vmatpush3.msra.mxu1 %v2307_v50  ;;  %v2365_v60 = vld [vmem:[#allocation5 + $0x3f8] sm:$0xff] }
 0x36a   :  { %2128 = vmatprep.subr.mxu0 %v2308_v14  ;;  %2163 = vmatprep.subr.mxu1 %v2309_v52 }
 0x36b   :  { %2129 = vmatpush3.msra.mxu0 %v2310_v26  ;;  %2164 = vmatpush3.msra.mxu1 %v2311_v27 }
 0x36c   :  { %2130 = vmatprep.subr.mxu0 %v2312_v28  ;;  %2165 = vmatprep.subr.mxu1 %v2313_v29 }
 0x36d   :  { %2131 = vmatpush3.msra.mxu0 %v2314_v30  ;;  %2166 = vmatpush3.msra.mxu1 %v2315_v31 }
 0x36e   :  { %2132 = vmatprep.subr.mxu0 %v2316_v33  ;;  %2167 = vmatprep.subr.mxu1 %v2317_v34 }
 0x36f   :  { %2133 = vmatpush3.msra.mxu0 %v2318_v36  ;;  %2168 = vmatpush3.msra.mxu1 %v2319_v51 }
 0x370   :  { %2134 = vmatprep.subr.mxu0 %v2320_v15  ;;  %2169 = vmatprep.subr.mxu1 %v2321_v44 }
 0x371   :  { %2135 = vmatpush3.msra.mxu0 %v2322_v53  ;;  %2170 = vmatpush3.msra.mxu1 %v2323_v59 }
 0x372   :  { %2136 = vmatprep.subr.mxu0 %v2324_v45  ;;  %2171 = vmatprep.subr.mxu1 %v2325_v39 }
 0x373   :  { %2137 = vmatpush3.msra.mxu0 %v2326_v13  ;;  %2172 = vmatpush3.msra.mxu1 %v2327_v46 }
 0x374   :  { %2138 = vmatprep.subr.mxu0 %v2328_v24  ;;  %2173 = vmatprep.subr.mxu1 %v2329_v47 }
 0x375   :  { %2139 = vmatpush3.msra.mxu0 %v2330_v63  ;;  %2174 = vmatpush3.msra.mxu1 %v2331_v55 }
 0x376   :  { %2140 = vmatprep.subr.mxu0 %v2332_v58  ;;  %2175 = vmatprep.subr.mxu1 %v2333_v38 }
 0x377   :  { %2141 = vmatpush3.msra.mxu0 %v2334_v0  ;;  %2176 = vmatpush3.msra.mxu1 %v2335_v3 }
 0x378   :  { %2142 = vmatprep.subr.mxu0 %v2336_v54  ;;  %2177 = vmatprep.subr.mxu1 %v2337_v1 }
 0x379   :  { %2143 = vmatpush3.msra.mxu0 %v2338_v2  ;;  %2178 = vmatpush3.msra.mxu1 %v2339_v5 }
 0x37a   :  { %2144 = vmatprep.subr.mxu0 %v2340_v6  ;;  %2179 = vmatprep.subr.mxu1 %v2341_v7 }
 0x37b   :  { %2145 = vmatpush3.msra.mxu0 %v2342_v8  ;;  %2180 = vmatpush3.msra.mxu1 %v2343_v9 }
 0x37c   :  { %2146 = vmatprep.subr.mxu0 %v2344_v10  ;;  %2181 = vmatprep.subr.mxu1 %v2345_v11 }
 0x37d   :  { %2147 = vmatpush3.msra.mxu0 %v2346_v12  ;;  %2182 = vmatpush3.msra.mxu1 %v2347_v16 }
 0x37e   :  { %2148 = vmatprep.subr.mxu0 %v2348_v17  ;;  %2183 = vmatprep.subr.mxu1 %v2349_v18 }
 0x37f   :  { %2149 = vmatpush3.msra.mxu0 %v2350_v19  ;;  %2184 = vmatpush3.msra.mxu1 %v2351_v20 }
 0x380   :  { %2150 = vmatprep.subr.mxu0 %v2352_v21  ;;  %2185 = vmatprep.subr.mxu1 %v2353_v4 }
 0x381   :  { %2151 = vmatpush3.msra.mxu0 %v2354_v22  ;;  %2186 = vmatpush3.msra.mxu1 %v2355_v23 }
 0x382   :  { %2152 = vmatprep.subr.mxu0 %v2356_v43  ;;  %2187 = vmatprep.subr.mxu1 %v2357_v37  ;;  %v3722_v37 = vld [vmem:[#allocation13_spill] sm:$0xff] }
 0x383   :  { %2153 = vmatpush3.msra.mxu0 %v2358_v49  ;;  %2188 = vmatpush3.msra.mxu1 %v2359_v35 }
 0x384   :  { %2154 = vmatprep.subr.mxu0 %v2360_v41  ;;  %2189 = vmatprep.subr.mxu1 %v2361_v62 }
 0x385   :  { %2155 = vmatpush3.msra.mxu0 %v2362_v61  ;;  %2190 = vmatpush3.msra.mxu1 %v2363_v25 }
 0x386   :  { %2194 = vmatprep.subr.mxu0 %v2364_v42  ;;  %2229 = vmatprep.subr.mxu1 %v2365_v60  ;;  %v2366_v42 = vld [vmem:[#allocation2] sm:$0xff] }
 0x3e6   :  { %v1033_v48 = vpop.f32.mrf.mxu0  ;;  %v1104_v26 = vpop.f32.mrf.mxu1 }
 0x3e7   :  { %v1251_v52 = vmul.f32 %v1033_v48, %v1033_v48  ;;  %v1253_v29 = vmul.f32 %v1104_v26, %v1104_v26 }
 0x3e8   :  { %v1035_v50 = vpop.f32.mrf.mxu0  ;;  %v1106_v31 = vpop.f32.mrf.mxu1 }
 0x3e9   :  { %v1252_v14 = vmul.f32 %v1035_v50, %v1035_v50  ;;  %v1259_v28 = vsel %vm516_vm0, %v1251_v52, 0.0  ;;  %v1262_v33 = vsel %vm516_vm0, %v1253_v29, 0.0  ;;  %v1254_v34 = vmul.f32 %v1106_v31, %v1106_v31 }
 0x3eb   :  { %v1260_v27 = vsel %vm516_vm0, %v1252_v14, 0.0  ;;  %v1264_v44 = vsel %vm516_vm0, %v1254_v34, 0.0  ;;  %v2368_v34 = vld [vmem:[#allocation5 + $0x278] sm:$0xff] }
 0x3ec   :  { %v1261_v30 = vadd.f32 %v1260_v27, %v1259_v28 }
 0x3ee   :  { %v1263_v36 = vadd.f32 %v1262_v33, %v1261_v30 }
 0x3f0   :  { %v1265_v59 = vadd.f32 %v1264_v44, %v1263_v36  ;;  %v2369_v36 = vld [vmem:[#allocation5 + $0x2f0] sm:$0xff]  ;;  %v2371_v44 = vld [vmem:[#allocation5 + $0x378] sm:$0xff] }
 0x426   :  { %v1175_v51 = vpop.f32.mrf.mxu0  ;;  %v1246_v15 = vpop.f32.mrf.mxu1 }
 0x427   :  { %v1255_v53 = vmul.f32 %v1175_v51, %v1175_v51  ;;  %v1257_v46 = vmul.f32 %v1246_v15, %v1246_v15 }
 0x428   :  { %v1177_v45 = vpop.f32.mrf.mxu0  ;;  %v1248_v39 = vpop.f32.mrf.mxu1 }
 0x429   :  { %v1266_v13 = vsel %vm516_vm0, %v1255_v53, 0.0  ;;  %v1256_v24 = vmul.f32 %v1177_v45, %v1177_v45  ;;  %v1258_v55 = vmul.f32 %v1248_v39, %v1248_v39  ;;  %v1270_v38 = vsel %vm516_vm0, %v1257_v46, 0.0  ;;  %v2372_v53 = vld [vmem:[#allocation5 + $0x2e8] sm:$0xff] }
 0x42a   :  { %v1267_v47 = vadd.f32 %v1266_v13, %v1265_v59  ;;  %v2373_v59 = vld [vmem:[#allocation5 + $0x3f0] sm:$0xff]  ;;  %v2376_v13 = vld [vmem:[#allocation5 + $0x2e0] sm:$0xff]  ;;  %v2377_v46 = vld [vmem:[#allocation5 + $0x3e8] sm:$0xff] }
 0x42b   :  { %v1268_v63 = vsel %vm516_vm0, %v1256_v24, 0.0  ;;  %v1272_v3 = vsel %vm516_vm0, %v1258_v55, 0.0  ;;  %v2378_v24 = vld [vmem:[#allocation5 + $0x260] sm:$0xff] }
 0x42c   :  { %v1269_v58 = vadd.f32 %v1268_v63, %v1267_v47  ;;  %v2379_v47 = vld [vmem:[#allocation5 + $0x368] sm:$0xff]  ;;  %v2380_v63 = vld [vmem:[#allocation5 + $0x2d8] sm:$0xff]  ;;  %v2381_v55 = vld [vmem:[#allocation5 + $0x3e0] sm:$0xff] }
 0x42e   :  { %v1271_v0 = vadd.f32 %v1270_v38, %v1269_v58  ;;  %v2382_v58 = vld [vmem:[#allocation5 + $0x258] sm:$0xff]  ;;  %v2383_v38 = vld [vmem:[#allocation5 + $0x360] sm:$0xff] }
 0x430   :  { %v1273_v54 = vadd.f32 %v1272_v3, %v1271_v0  ;;  %v2384_v0 = vld [vmem:[#allocation5 + $0x2d0] sm:$0xff]  ;;  %v2385_v3 = vld [vmem:[#allocation5 + $0x3d8] sm:$0xff] }
 0x432   :  { %1274 = vadd.xlane.f32.xlu1 %v1273_v54  ;;  %v2386_v54 = vld [vmem:[#allocation5 + $0x250] sm:$0xff] }
 0x4bb   :  { %v1275_v1 = vpop.xlane.xlu1 %1274 }
 0x4bc   :  { %2290 = vrsqrt.f32 %v1275_v1  ;;  %vm1278_vm3 = vcmp.eq.f32.partialorder %v1275_v1, inf  ;;  %v1281_v6 = vand.u32 2147483648, %v1275_v1  ;;  %vm1280_vm4 = vcmp.eq.f32.partialorder %v1275_v1, 0.0 }
 0x4c9   :  { %v2291_v2 = vpop.eup %2290 }
 0x4ca   :  { %v1277_v5 = vmul.f32 %v2291_v2, %v1275_v1  ;;  %v2388_v2 = vld [vmem:[#allocation5 + $0x2c8] sm:$0xff] }
 0x4cc   :  { %v1279_v7 = vsel %vm1278_vm3, %v1275_v1, %v1277_v5  ;;  %v2387_v1 = vld [vmem:[#allocation5 + $0x358] sm:$0xff]  ;;  %v2389_v5 = vld [vmem:[#allocation5 + $0x3d0] sm:$0xff] }
 0x4cd   :  { %v1282_v8 = vsel %vm1280_vm4, %v1281_v6, %v1279_v7  ;;  %v2390_v6 = vld [vmem:[#allocation5 + $0x248] sm:$0xff]  ;;  %v2391_v7 = vld [vmem:[#allocation5 + $0x350] sm:$0xff] }
 0x4ce   :  { %v1283_v9 = vadd.f32 1e-08, %v1282_v8  ;;  %v2392_v8 = vld [vmem:[#allocation5 + $0x2c0] sm:$0xff] }
 0x4d0   :  { %2292 = vrcp.f32 %v1283_v9  ;;  %v2393_v9 = vld [vmem:[#allocation5 + $0x3c8] sm:$0xff] }
 0x4d1   :  { %2294 = vlog2.f32 %v3196_v32 }
 0x4dd   :  { %v2293_v10 = vpop.eup %2292 }
 0x4de   :  { %v1285_v11 = vmul.f32 %v2293_v10, %v1033_v48  ;;  %v1286_v12 = vmul.f32 %v2293_v10, %v1035_v50  ;;  %v1287_v16 = vmul.f32 %v2293_v10, %v1104_v26  ;;  %v1288_v17 = vmul.f32 %v2293_v10, %v1106_v31  ;;  %v2367_v48 = vld [vmem:[#allocation2 + $0x8] sm:$0xff] }
 0x4df   :  { %v1289_v18 = vmul.f32 %v2293_v10, %v1175_v51  ;;  %v1290_v19 = vmul.f32 %v2293_v10, %v1177_v45  ;;  %v1291_v20 = vmul.f32 %v2293_v10, %v1246_v15  ;;  %v1292_v21 = vmul.f32 %v2293_v10, %v1248_v39  ;;  %v2370_v51 = vld [vmem:[#allocation5 + $0x270] sm:$0xff]  ;;  %v2374_v45 = vld [vmem:[#allocation5 + $0x268] sm:$0xff]  ;;  %v2394_v10 = vld [vmem:[#allocation5 + $0x240] sm:$0xff] }
 0x4e0   :  { %v1301_v4 = vcombine.low %v1285_v11, %v1286_v12  ;;  %v1302_v22 = vcombine.low %v1287_v16, %v1288_v17  ;;  %v2375_v39 = vld [vmem:[#allocation5 + $0x370] sm:$0xff]  ;;  %v2395_v11 = vld [vmem:[#allocation5 + $0x348] sm:$0xff]  ;;  %v2396_v12 = vld [vmem:[#allocation5 + $0x2b8] sm:$0xff] }
 0x4e1   :  { %v1318_v23 = vcombine.low %v1289_v18, %v1290_v19  ;;  %v1319_v43 = vcombine.low %v1291_v20, %v1292_v21  ;;  %v2397_v16 = vld [vmem:[#allocation5 + $0x3c0] sm:$0xff]  ;;  %v2398_v17 = vld [vmem:[#allocation5 + $0x238] sm:$0xff]  ;;  %v2400_v19 = vld [vmem:[#allocation5 + $0x2b0] sm:$0xff] }
 0x4e2   :  { %v1309_v49 = vrot.slane %v1301_v4, %v3722_v37  ;;  %v1316_v35 = vrot.slane %v1302_v22, %v3722_v37  ;;  %v2399_v18 = vld [vmem:[#allocation5 + $0x340] sm:$0xff]  ;;  %v2401_v20 = vld [vmem:[#allocation5 + $0x3b8] sm:$0xff]  ;;  %v2402_v21 = vld [vmem:[#allocation5 + $0x230] sm:$0xff] }
 0x4e3   :  { %v1326_v41 = vrot.slane %v1318_v23, %v3722_v37  ;;  %v1333_v62 = vrot.slane %v1319_v43, %v3722_v37  ;;  %v2403_v4 = vld [vmem:[#allocation5 + $0x338] sm:$0xff]  ;;  %v2404_v22 = vld [vmem:[#allocation5 + $0x2a8] sm:$0xff]  ;;  %v2405_v23 = vld [vmem:[#allocation5 + $0x3b0] sm:$0xff] }
 0x4e4   :  { %v1317_v61 = vcombine.low %v1309_v49, %v1316_v35  ;;  %v2406_v43 = vld [vmem:[#allocation5 + $0x228] sm:$0xff]  ;;  %v2408_v49 = vld [vmem:[#allocation5 + $0x2a0] sm:$0xff] }
 0x4e5   :  { %v1334_v25 = vcombine.low %v1326_v41, %v1333_v62  ;;  %v2409_v35 = vld [vmem:[#allocation5 + $0x3a8] sm:$0xff]  ;;  %v2410_v41 = vld [vmem:[#allocation5 + $0x220] sm:$0xff] }
 0x4e6   :  { %v1337_v60 = vadd.f32 %v2366_v42, %v1317_v61  ;;  %v2411_v62 = vld [vmem:[#allocation5 + $0x328] sm:$0xff]  ;;  %v2412_v61 = vld [vmem:[#allocation5 + $0x298] sm:$0xff] }
 0x4e7   :  { %v1338_v50 = vadd.f32 %v2367_v48, %v1334_v25  ;;  %v2413_v25 = vld [vmem:[#allocation5 + $0x3a0] sm:$0xff]  ;;  %v2414_v42 = vld [vmem:[#allocation5 + $0x218] sm:$0xff]  ;;  %v2416_v48 = vld [vmem:[#allocation5 + $0x290] sm:$0xff] }
 0x4e8   :  { %v1348_v14 = vrot.slane %v1337_v60, %v3722_v37  ;;  %v1341_v52 = vcombine.high %v1337_v60, %v1337_v60  ;;  %v2415_v60 = vld [vmem:[#allocation5 + $0x320] sm:$0xff] }
 0x4e9   :  { %v3288_v26 = vrot.slane %v1338_v50, %v3722_v37  ;;  %v1358_v27 = vcombine.high %v1338_v50, %v1338_v50  ;;  %v2417_v50 = vld [vmem:[#allocation5 + $0x398] sm:$0xff] }
 0x4ea   :  { %v1356_v28 = vcombine.high %v1348_v14, %v1348_v14  ;;  %v1355_v29 = vrot.slane %v1341_v52, %v3722_v37  ;;  %v2419_v52 = vld [vmem:[#allocation5 + $0x318] sm:$0xff] }
 0x4eb   :  { %v3292_v31 = vrot.slane %v1358_v27, %v3722_v37  ;;  %v1373_v33 = vcombine.high %v3288_v26, %v3288_v26  ;;  %v2407_v37 = vld [vmem:[#allocation5 + $0x330] sm:$0xff]  ;;  %v2420_v27 = vld [vmem:[#allocation5 + $0x288] sm:$0xff] }
 0x4ec   :  { %1447 = vmatprep.mubr.f32.mxu0 %v1356_v28  ;;  %v1357_v30 = vcombine.high %v1355_v29, %v1355_v29  ;;  %v2421_v28 = vld [vmem:[#allocation5 + $0x390] sm:$0xff] }
 0x4ed   :  { %1448 = vmatmul.mubr.f32.vlgmr.msra.gmra.mxu0 %v1348_v14  ;;  %v1374_v15 = vcombine.high %v3292_v31, %v3292_v31  ;;  %v2418_v14 = vld [vmem:[#allocation5 + $0x210] sm:$0xff] }
 0x4ee   :  { %2195 = vmatpush3.msra.mxu0 %v2368_v34  ;;  %1517 = vmatprep.mubr.f32.mxu1 %v1357_v30  ;;  %v2423_v30 = vld [vmem:[#allocation5 + $0x310] sm:$0xff]  ;;  %v2425_v34 = vld [vmem:[#allocation5 + $0x388] sm:$0xff] }
 0x4ef   :  { %2196 = vmatprep.subr.mxu0 %v2369_v36  ;;  %1587 = vmatprep.mubr.f32.mxu0 %v1373_v33  ;;  %v2424_v33 = vld [vmem:[#allocation5 + $0x280] sm:$0xff] }
 0x4f0   :  { %1518 = vmatmul.mubr.f32.vlgmr.msra.gmra.mxu1 %v1355_v29  ;;  %2197 = vmatpush3.msra.mxu0 %v2370_v51  ;;  %v2422_v29 = vld [vmem:[#allocation5 + $0x208] sm:$0xff]  ;;  %v2426_v36 = vld [vmem:[#allocation5 + $0x200] sm:$0xff] }
 0x4f1   :  { %2230 = vmatpush3.msra.mxu1 %v2371_v44  ;;  %2198 = vmatprep.subr.mxu0 %v2372_v53  ;;  %v2427_v51 = vld [vmem:[#allocation5 + $0x308] sm:$0xff]  ;;  %v2429_v44 = vld [vmem:[#allocation5 + $0x300] sm:$0xff] }
 0x4f2   :  { %2231 = vmatprep.subr.mxu1 %v2373_v59  ;;  %1657 = vmatprep.mubr.f32.mxu1 %v1374_v15  ;;  %v2428_v15 = vld [vmem:[#allocation5 + $0x380] sm:$0xff] }
 0x4f3   :  { %2199 = vmatpush3.msra.mxu0 %v2374_v45  ;;  %2232 = vmatpush3.msra.mxu1 %v2375_v39 }
 0x4f4   :  { %2200 = vmatprep.subr.mxu0 %v2376_v13  ;;  %2233 = vmatprep.subr.mxu1 %v2377_v46  ;;  %v2295_v46 = vpop.eup %2294 }
 0x4f5   :  { %2201 = vmatpush3.msra.mxu0 %v2378_v24  ;;  %2234 = vmatpush3.msra.mxu1 %v2379_v47 }
 0x4f6   :  { %2202 = vmatprep.subr.mxu0 %v2380_v63  ;;  %2235 = vmatprep.subr.mxu1 %v2381_v55  ;;  %v527_v55 = vmul.f32 0.6931472, %v2295_v46 }
 0x4f7   :  { %2203 = vmatpush3.msra.mxu0 %v2382_v58  ;;  %2236 = vmatpush3.msra.mxu1 %v2383_v38 }
 0x4f8   :  { %2204 = vmatprep.subr.mxu0 %v2384_v0  ;;  %2237 = vmatprep.subr.mxu1 %v2385_v3  ;;  %v528_v32 = vsub.f32 %v3189_v57, %v527_v55 }
 0x4f9   :  { %2205 = vmatpush3.msra.mxu0 %v2386_v54  ;;  %2238 = vmatpush3.msra.mxu1 %v2387_v1 }
 0x4fa   :  { %2206 = vmatprep.subr.mxu0 %v2388_v2  ;;  %2239 = vmatprep.subr.mxu1 %v2389_v5  ;;  %v531_v5 = vmul.f32 %v3199_v40, %v528_v32 }
 0x4fb   :  { %2207 = vmatpush3.msra.mxu0 %v2390_v6  ;;  %2240 = vmatpush3.msra.mxu1 %v2391_v7 }
 0x4fc   :  { %2208 = vmatprep.subr.mxu0 %v2392_v8  ;;  %2241 = vmatprep.subr.mxu1 %v2393_v9 }
 0x4fd   :  { %2209 = vmatpush3.msra.mxu0 %v2394_v10  ;;  %2242 = vmatpush3.msra.mxu1 %v2395_v11 }
 0x4fe   :  { %2210 = vmatprep.subr.mxu0 %v2396_v12  ;;  %2243 = vmatprep.subr.mxu1 %v2397_v16 }
 0x4ff   :  { %2211 = vmatpush3.msra.mxu0 %v2398_v17  ;;  %2244 = vmatpush3.msra.mxu1 %v2399_v18 }
 0x500   :  { %2212 = vmatprep.subr.mxu0 %v2400_v19  ;;  %2245 = vmatprep.subr.mxu1 %v2401_v20 }
 0x501   :  { %2213 = vmatpush3.msra.mxu0 %v2402_v21  ;;  %2246 = vmatpush3.msra.mxu1 %v2403_v4 }
 0x502   :  { %2214 = vmatprep.subr.mxu0 %v2404_v22  ;;  %2247 = vmatprep.subr.mxu1 %v2405_v23 }
 0x503   :  { %2215 = vmatpush3.msra.mxu0 %v2406_v43  ;;  %2248 = vmatpush3.msra.mxu1 %v2407_v37 }
 0x504   :  { %2216 = vmatprep.subr.mxu0 %v2408_v49  ;;  %2249 = vmatprep.subr.mxu1 %v2409_v35 }
 0x505   :  { %2217 = vmatpush3.msra.mxu0 %v2410_v41  ;;  %2250 = vmatpush3.msra.mxu1 %v2411_v62 }
 0x506   :  { %2218 = vmatprep.subr.mxu0 %v2412_v61  ;;  %2251 = vmatprep.subr.mxu1 %v2413_v25 }
 0x507   :  { %2219 = vmatpush3.msra.mxu0 %v2414_v42  ;;  %2252 = vmatpush3.msra.mxu1 %v2415_v60 }
 0x508   :  { %2220 = vmatprep.subr.mxu0 %v2416_v48  ;;  %2253 = vmatprep.subr.mxu1 %v2417_v50 }
 0x509   :  { %2221 = vmatpush3.msra.mxu0 %v2418_v14  ;;  %2254 = vmatpush3.msra.mxu1 %v2419_v52 }
 0x50a   :  { %2222 = vmatprep.subr.mxu0 %v2420_v27  ;;  %2255 = vmatprep.subr.mxu1 %v2421_v28 }
 0x50b   :  { %2223 = vmatpush3.msra.mxu0 %v2422_v29  ;;  %2256 = vmatpush3.msra.mxu1 %v2423_v30 }
 0x50c   :  { %2224 = vmatprep.subr.mxu0 %v2424_v33  ;;  %2257 = vmatprep.subr.mxu1 %v2425_v34 }
 0x50d   :  { %2225 = vmatpush3.msra.mxu0 %v2426_v36  ;;  %2258 = vmatpush3.msra.mxu1 %v2427_v51 }
 0x50e   :  { %1588 = vmatmul.mubr.f32.vlgmr.msra.gmra.mxu0 %v3288_v26  ;;  %2259 = vmatprep.subr.mxu1 %v2428_v15 }
 0x50f   :  { %2260 = vmatpush3.msra.mxu1 %v2429_v44 }
 0x510   :  { %1658 = vmatmul.mubr.f32.vlgmr.msra.gmra.mxu1 %v3292_v31 }
 0x5ad   :  { %v2156_v53 = vpop.f32.mrf.mxu0 }
 0x5af   :  { %v2157_v59 = vpop.f32.mrf.mxu0 }
 0x5b0   :  { %v2191_v45 = vpop.f32.mrf.mxu1  ;;  %v2158_v39 = vadd.f32 %v2157_v59, %v2156_v53 }
 0x5b2   :  { %v2192_v13 = vpop.f32.mrf.mxu1  ;;  %v1450_v24 = vadd.f32 %v2158_v39, %v3117_v56  ;;  %v532_v56 = vsel %vm516_vm0, %v531_v5, 0.0 }
 0x5b3   :  { %v2193_v47 = vadd.f32 %v2192_v13, %v2191_v45 }
 0x5b5   :  { %v1520_v38 = vadd.f32 %v2193_v47, %v1450_v24 }
 0x5ce   :  { %v2226_v63 = vpop.f32.mrf.mxu0 }
 0x5d0   :  { %v2227_v26 = vpop.f32.mrf.mxu0  ;;  %v2261_v58 = vpop.f32.mrf.mxu1 }
 0x5d1   :  { %v2228_v0 = vadd.f32 %v2227_v26, %v2226_v63 }
 0x5d2   :  { %v2262_v3 = vpop.f32.mrf.mxu1 }
 0x5d3   :  { %v1590_v54 = vadd.f32 %v2228_v0, %v1520_v38  ;;  %v2263_v31 = vadd.f32 %v2262_v3, %v2261_v58 }
 0x5d5   :  { %v1660_v1 = vadd.f32 %v2263_v31, %v1590_v54 }
 0x5d7   :  { %v1663_v2 = vsel %vm516_vm0, %v1660_v1, -inf }
 0x5d8   :  { %1664 = vmax.xlane.f32.xlu0 %v1663_v2 }
 0x5dc   :  { %533 = vadd.xlane.f32.xlu0 %v532_v56 }
 0x661   :  { %v1665_v6 = vpop.xlane.xlu0 %1664 }
 0x662   :  { %v1666_v7 = vsub.f32 %v1660_v1, %v1665_v6 }
 0x664   :  { %v1667_v8 = vmul.f32 1.442695, %v1666_v7 }
 0x665   :  { %v534_v9 = vpop.xlane.xlu0 %533 }
 0x666   :  { %2296 = vpow2.f32 %v1667_v8  ;;  %v535_v10 = vrot.slane %v534_v9, 4 }
 0x668   :  { %v536_v11 = vadd.f32 %v535_v10, %v534_v9 }
 0x66a   :  { %v537_v12 = vrot.slane %v536_v11, 2 }
 0x66c   :  { %v538_v16 = vadd.f32 %v537_v12, %v536_v11 }
 0x66e   :  { %v539_v17 = vrot.slane %v538_v16, 1 }
 0x670   :  { %v540_v57 = vadd.f32 %v539_v17, %v538_v16 }
 0x672   :  { %2264 = vpush %v540_v57 }
 0x673   :  { %v2297_v18 = vpop.eup %2296 }
 0x674   :  { %v1669_v19 = vsel %vm516_vm0, %v2297_v18, 0.0 }
 0x675   :  { %1670 = vadd.xlane.f32.xlu1 %v1669_v19 }
 0x6a3   :  { %s2265_s2 = spop %2264 }
 0x6fe   :  { %v1671_v20 = vpop.xlane.xlu1 %1670 }
 0x6ff   :  { %2298 = vlog2.f32 %v1671_v20 }
 0x70c   :  { %v2299_v21 = vpop.eup %2298 }
 0x70d   :  { %v1673_v4 = vmul.f32 0.6931472, %v2299_v21 }
 0x70f   :  { %v1674_v22 = vsub.f32 %v1666_v7, %v1673_v4 }
 0x711   :  { %v1675_v23 = vmul.f32 %v1674_v22, %v3199_v40 }
 0x713   :  { %v1676_v43 = vsel %vm516_vm0, %v1675_v23, 0.0 }
 0x714   :  { %1677 = vadd.xlane.f32.xlu1 %v1676_v43 }
 0x79d   :  { %v1678_v37 = vpop.xlane.xlu1 %1677 }
 0x79e   :  { %v1679_v49 = vrot.slane %v1678_v37, 4 }
 0x7a0   :  { %v1680_v35 = vadd.f32 %v1679_v49, %v1678_v37 }
 0x7a2   :  { %v1681_v41 = vrot.slane %v1680_v35, 2 }
 0x7a4   :  { %v1682_v62 = vadd.f32 %v1681_v41, %v1680_v35 }
 0x7a6   :  { %v1683_v61 = vrot.slane %v1682_v62, 1 }
 0x7a8   :  { %v1684_v25 = vadd.f32 %v1683_v61, %v1682_v62 }
 0x7aa   :  { %2266 = vpush %v1684_v25 }
 0x7db   :  { %s2267_s5 = spop %2266 }
 0x7dc   :  { %s1686_s6 = ssub.f32 %s2265_s2, %s2267_s5 }
 0x7de   :  { %s1689_s7 = smul.f32 0.5, %s1686_s6 }
 0x7e0   :  { %1691 = sst [smem:[#allocation8]] %s1689_s7 }
 0x7e1   :  { %1699 = dma.smem_to_hbm %s2511_s8, 16, %s3316_s4, [#allocation4]  }
 0x7e2   :  { %2502 = dma.done.wait [#allocation4], 16  }
 0x7e3   :  { %2503 = vsyncadd [#allocation4], 4294967280 }
 0x7e4   :  { %1703 = sfence }
 0x7e5   :  { %1704 = vsyncpa [#allocation3], 1 }
 0x7e6   :  { %1705 = vsyncpa [#allocation6], 1 }
 0x7e7   :  { %1706 = vsyncpa [#allocation4], 1 }

</bundles_post_ra>
